<compile_context>
chip_gen: v6e
topology: v6e:2x2x1
jax: 0.10.0
libtpu: 0.0.40
codegen_flags: <defaults>
</compile_context>

<pallas_src>
import jax
import jax.numpy as jnp
import numpy as np
from jax.experimental import pallas as pl
from jax.experimental.pallas import tpu as pltpu


# ------------------------------ fused kernel ------------------------------- #

def _lenet_kernel(x_ref, cb1_ref, vt1_ref, b1_ref, hs1_ref, vs1_ref,
                  cb2_ref, vt2_ref, b2_ref, hs2_ref, vs2_ref,
                  rs_ref, w1_ref, bf1_ref, w2_ref, bf2_ref, w3_ref, bf3_ref,
                  o_ref):
    """Whole LeNet forward on VMEM-resident data; only 2-D matmuls + VPU ops."""
    def mm(a, b):
        return jnp.dot(a, b, preferred_element_type=jnp.float32)

    x = x_ref[...]                                             # (N*28, 28)

    # conv1: 5x5 valid conv = banded matmuls (width) + tap-shift matmuls (height).
    conv1 = mm(vt1_ref[0], mm(x, cb1_ref[0]))                  # (N*24, 6*24)
    for i in range(1, 5):
        conv1 = conv1 + mm(vt1_ref[i], mm(x, cb1_ref[i]))
    a1 = jnp.maximum(conv1 + b1_ref[...], 0.0)                 # bias + relu

    # 2x2/2 max pool: even/odd lane selection, then even/odd sublane selection.
    h1 = jnp.maximum(mm(a1, hs1_ref[0]), mm(a1, hs1_ref[1]))   # (N*24, 6*12)
    p1 = jnp.maximum(mm(vs1_ref[0], h1), mm(vs1_ref[1], h1))   # (N*12, 6*12)

    # conv2 (6 -> 12 channels), same banded-matmul formulation.
    conv2 = mm(vt2_ref[0], mm(p1, cb2_ref[0]))                 # (N*8, 12*8)
    for i in range(1, 5):
        conv2 = conv2 + mm(vt2_ref[i], mm(p1, cb2_ref[i]))
    a2 = jnp.maximum(conv2 + b2_ref[...], 0.0)

    h2 = jnp.maximum(mm(a2, hs2_ref[0]), mm(a2, hs2_ref[1]))   # (N*8, 12*4)
    p2 = jnp.maximum(mm(vs2_ref[0], h2), mm(vs2_ref[1], h2))   # (N*4, 12*4)

    # Flatten + fc1 fused: the torch NCHW flatten permutation is folded into
    # the four (48, 120) row-blocks of the repacked fc1 weight.
    t = mm(mm(rs_ref[0], p2), w1_ref[0])                       # (N, 120)
    for y in range(1, 4):
        t = t + mm(mm(rs_ref[y], p2), w1_ref[y])
    t = jnp.maximum(t + bf1_ref[...], 0.0)

    t = jnp.maximum(mm(t, w2_ref[...]) + bf2_ref[...], 0.0)    # (N, 60)
    o_ref[...] = mm(t, w3_ref[...]) + bf3_ref[...]             # (N, 10)


# ------------------------- one-time weight repacking ------------------------ #

def _banded_conv_mats(w, in_w):
    """(OC, IC, KH, KW) conv weight -> (KH, IC*in_w, OC*out_w) band matrices.

    mats[i][ic*in_w + x + j, oc*out_w + x] = w[oc, ic, i, j], so that
    (rows @ mats[i]) performs the horizontal (width) part of the conv for
    vertical tap i, for all output channels at once.
    """
    oc_n, ic_n, kh, kw = w.shape
    out_w = in_w - kw + 1
    i, ic, oc, j, x = (a.ravel() for a in np.meshgrid(
        np.arange(kh), np.arange(ic_n), np.arange(oc_n),
        np.arange(kw), np.arange(out_w), indexing="ij"))
    vals = w[oc, ic, i, j]
    mats = jnp.zeros((kh, ic_n * in_w, oc_n * out_w), jnp.float32)
    return mats.at[i, ic * in_w + x + j, oc * out_w + x].set(vals)


def _vtap_sel(n, kh, out_h):
    """(KH, n*out_h, n*in_h) 0/1 matrices: vertical tap-i shift per image."""
    in_h = out_h + kh - 1
    sel = np.zeros((kh, n * out_h, n * in_h), np.float32)
    for i in range(kh):
        for b in range(n):
            for y in range(out_h):
                sel[i, b * out_h + y, b * in_h + i + y] = 1.0
    return sel


def _hpool_sel(nchan, w):
    """(2, nchan*w, nchan*(w//2)) even/odd column selectors (lane pooling)."""
    sel = np.zeros((2, nchan * w, nchan * (w // 2)), np.float32)
    for d in range(2):
        for c in range(nchan):
            for px in range(w // 2):
                sel[d, c * w + 2 * px + d, c * (w // 2) + px] = 1.0
    return sel


def _vpool_sel(n, h):
    """(2, n*(h//2), n*h) even/odd row selectors (sublane pooling)."""
    sel = np.zeros((2, n * (h // 2), n * h), np.float32)
    for d in range(2):
        for b in range(n):
            for py in range(h // 2):
                sel[d, b * (h // 2) + py, b * h + 2 * py + d] = 1.0
    return sel


def _row_sel(n, h):
    """(h, n, n*h) selectors: rs[y] picks row y of every image."""
    sel = np.zeros((h, n, n * h), np.float32)
    for y in range(h):
        for b in range(n):
            sel[y, b, b * h + y] = 1.0
    return sel


def prepare_params(params, batch):
    """One-time repack of torch-layout weights into kernel operands."""
    # fc1: fold the torch NCHW flatten (k = oc*16 + y*4 + x) into our kernel
    # layout (c = y*48 + oc*4 + x), then split into 4 row blocks.
    c = np.arange(192)
    y, oc, x = c // 48, (c % 48) // 4, c % 4
    k = oc * 16 + y * 4 + x
    w1p = params["fc1_w"].T[k, :]                             # (192, 120)

    return {
        "cb1": _banded_conv_mats(params["conv1_w"], 28),      # (5, 28, 144)
        "vt1": jnp.asarray(_vtap_sel(batch, 5, 24)),          # (5, N*24, N*28)
        "b1row": jnp.repeat(params["conv1_b"], 24)[None, :],  # (1, 144)
        "hs1": jnp.asarray(_hpool_sel(6, 24)),                # (2, 144, 72)
        "vs1": jnp.asarray(_vpool_sel(batch, 24)),            # (2, N*12, N*24)
        "cb2": _banded_conv_mats(params["conv2_w"], 12),      # (5, 72, 96)
        "vt2": jnp.asarray(_vtap_sel(batch, 5, 8)),           # (5, N*8, N*12)
        "b2row": jnp.repeat(params["conv2_b"], 8)[None, :],   # (1, 96)
        "hs2": jnp.asarray(_hpool_sel(12, 8)),                # (2, 96, 48)
        "vs2": jnp.asarray(_vpool_sel(batch, 8)),             # (2, N*4, N*8)
        "rs": jnp.asarray(_row_sel(batch, 4)),                # (4, N, N*4)
        "w1blk": jnp.reshape(w1p, (4, 48, 120)),
        "b1f": params["fc1_b"][None, :],
        "w2p": params["fc2_w"].T,
        "b2f": params["fc2_b"][None, :],
        "w3p": params["out_w"].T,
        "b3f": params["out_b"][None, :],
    }


def network_forward(prep, x):
    """Single fused pallas_call for the whole forward pass."""
    n = x.shape[0]
    x2d = x.astype(jnp.float32).reshape(n * 28, 28)
    vmem = pl.BlockSpec(memory_space=pltpu.MemorySpace.VMEM)
    return pl.pallas_call(
        _lenet_kernel,
        out_shape=jax.ShapeDtypeStruct((n, 10), jnp.float32),
        in_specs=[vmem] * 18,
        out_specs=vmem,
        cost_estimate=pl.CostEstimate(flops=12_000_000, transcendentals=0,
                                      bytes_accessed=500_000),
    )(x2d, prep["cb1"], prep["vt1"], prep["b1row"], prep["hs1"], prep["vs1"],
      prep["cb2"], prep["vt2"], prep["b2row"], prep["hs2"], prep["vs2"],
      prep["rs"], prep["w1blk"], prep["b1f"], prep["w2p"], prep["b2f"],
      prep["w3p"], prep["b3f"])


# --------------------------- params / reference ---------------------------- #

def init_params(key):
    """Deterministic init mirroring PyTorch's default U(-1/sqrt(fan_in), ...)."""
    def uinit(k, shape, fan_in):
        bound = 1.0 / np.sqrt(fan_in)
        return jax.random.uniform(k, shape, jnp.float32, -bound, bound)

    ks = jax.random.split(key, 10)
    return {
        "conv1_w": uinit(ks[0], (6, 1, 5, 5), 1 * 5 * 5),
        "conv1_b": uinit(ks[1], (6,), 1 * 5 * 5),
        "conv2_w": uinit(ks[2], (12, 6, 5, 5), 6 * 5 * 5),
        "conv2_b": uinit(ks[3], (12,), 6 * 5 * 5),
        "fc1_w": uinit(ks[4], (120, 192), 192),
        "fc1_b": uinit(ks[5], (120,), 192),
        "fc2_w": uinit(ks[6], (60, 120), 120),
        "fc2_b": uinit(ks[7], (60,), 120),
        "out_w": uinit(ks[8], (10, 60), 60),
        "out_b": uinit(ks[9], (10,), 60),
    }


def reference_forward(params, x):
    """Pure-JAX reference matching the PyTorch forward exactly."""
    def conv(t, w, b):
        dn = jax.lax.conv_dimension_numbers(t.shape, w.shape,
                                            ("NCHW", "OIHW", "NCHW"))
        t = jax.lax.conv_general_dilated(t, w, (1, 1), "VALID",
                                         dimension_numbers=dn)
        return t + b[None, :, None, None]

    t = jax.nn.relu(conv(x, params["conv1_w"], params["conv1_b"]))
    t = jax.lax.reduce_window(t, -jnp.inf, jax.lax.max,
                              (1, 1, 2, 2), (1, 1, 2, 2), "VALID")
    t = jax.nn.relu(conv(t, params["conv2_w"], params["conv2_b"]))
    t = jax.lax.reduce_window(t, -jnp.inf, jax.lax.max,
                              (1, 1, 2, 2), (1, 1, 2, 2), "VALID")
    t = t.reshape(t.shape[0], -1)
    t = jax.nn.relu(t @ params["fc1_w"].T + params["fc1_b"])
    t = jax.nn.relu(t @ params["fc2_w"].T + params["fc2_b"])
    return t @ params["out_w"].T + params["out_b"]


# ---------------------------------- main ------------------------------------ #

if __name__ == "__main__":
    key = jax.random.PRNGKey(0)
    pkey, xkey = jax.random.split(key)
    params = init_params(pkey)

    # MNIST-style input implied by the module: 1 channel, 28x28 -> 12*4*4 flat.
    x = jax.random.normal(xkey, (2, 1, 28, 28), jnp.float32)

    prep = prepare_params(params, batch=x.shape[0])   # one-time weight repack
    out = jax.jit(network_forward)(prep, x)
    out = jax.block_until_ready(out)
    assert out.shape == (2, 10)

    ref = reference_forward(params, x)
    # Tolerance reflects TPU default matmul precision (bf16 MXU passes) in the
    # XLA reference and the kernel; the computation itself is structurally exact
    # (tightened 2.5x vs the previous 5e-2).
    np.testing.assert_allclose(np.asarray(out), np.asarray(ref),
                               rtol=2e-2, atol=2e-2)
    print("KERNEL_OK")
</pallas_src>

<mosaic_0001>
module attributes {stable_mosaic.version = 11 : i64} {
  func.func @_lenet_kernel(%arg0: memref<56x28xf32, #tpu.memory_space<vmem>>, %arg1: memref<5x28x144xf32, #tpu.memory_space<vmem>>, %arg2: memref<5x48x56xf32, #tpu.memory_space<vmem>>, %arg3: memref<1x144xf32, #tpu.memory_space<vmem>>, %arg4: memref<2x144x72xf32, #tpu.memory_space<vmem>>, %arg5: memref<2x24x48xf32, #tpu.memory_space<vmem>>, %arg6: memref<5x72x96xf32, #tpu.memory_space<vmem>>, %arg7: memref<5x16x24xf32, #tpu.memory_space<vmem>>, %arg8: memref<1x96xf32, #tpu.memory_space<vmem>>, %arg9: memref<2x96x48xf32, #tpu.memory_space<vmem>>, %arg10: memref<2x8x16xf32, #tpu.memory_space<vmem>>, %arg11: memref<4x2x8xf32, #tpu.memory_space<vmem>>, %arg12: memref<4x48x120xf32, #tpu.memory_space<vmem>>, %arg13: memref<1x120xf32, #tpu.memory_space<vmem>>, %arg14: memref<120x60xf32, #tpu.memory_space<vmem>>, %arg15: memref<1x60xf32, #tpu.memory_space<vmem>>, %arg16: memref<60x10xf32, #tpu.memory_space<vmem>>, %arg17: memref<1x10xf32, #tpu.memory_space<vmem>>, %arg18: memref<2x10xf32, #tpu.memory_space<vmem>>) attributes {dimension_semantics = [], scalar_prefetch = 0 : i64, scratch_operands = 0 : i64, tpu.core_type = #tpu.core_type<tc>} {
    %c0 = arith.constant 0 : index
    %c0_0 = arith.constant 0 : index
    %0 = vector.load %arg0[%c0, %c0_0] : memref<56x28xf32, #tpu.memory_space<vmem>>, vector<56x28xf32>
    %c0_1 = arith.constant 0 : index
    %c0_2 = arith.constant 0 : index
    %c0_3 = arith.constant 0 : index
    %1 = vector.load %arg2[%c0_1, %c0_2, %c0_3] : memref<5x48x56xf32, #tpu.memory_space<vmem>>, vector<1x48x56xf32>
    %2 = vector.shape_cast %1 : vector<1x48x56xf32> to vector<48x56xf32>
    %c0_4 = arith.constant 0 : index
    %c0_5 = arith.constant 0 : index
    %c0_6 = arith.constant 0 : index
    %3 = vector.load %arg1[%c0_4, %c0_5, %c0_6] : memref<5x28x144xf32, #tpu.memory_space<vmem>>, vector<1x28x144xf32>
    %4 = vector.shape_cast %3 : vector<1x28x144xf32> to vector<28x144xf32>
    %cst = arith.constant dense<0.000000e+00> : vector<56x144xf32>
    %5 = tpu.matmul %0, %4, %cst {dimension_numbers = #tpu.dot_dimension_numbers<[1], [0], [0], [1], [0, 0, 1, 1], [], []>} : vector<56x28xf32>, vector<28x144xf32>, vector<56x144xf32> -> vector<56x144xf32>
    %cst_7 = arith.constant dense<0.000000e+00> : vector<48x144xf32>
    %6 = tpu.matmul %2, %5, %cst_7 {dimension_numbers = #tpu.dot_dimension_numbers<[1], [0], [0], [1], [0, 0, 1, 1], [], []>} : vector<48x56xf32>, vector<56x144xf32>, vector<48x144xf32> -> vector<48x144xf32>
    %c1 = arith.constant 1 : index
    %c0_8 = arith.constant 0 : index
    %c0_9 = arith.constant 0 : index
    %7 = vector.load %arg2[%c1, %c0_8, %c0_9] : memref<5x48x56xf32, #tpu.memory_space<vmem>>, vector<1x48x56xf32>
    %8 = vector.shape_cast %7 : vector<1x48x56xf32> to vector<48x56xf32>
    %c1_10 = arith.constant 1 : index
    %c0_11 = arith.constant 0 : index
    %c0_12 = arith.constant 0 : index
    %9 = vector.load %arg1[%c1_10, %c0_11, %c0_12] : memref<5x28x144xf32, #tpu.memory_space<vmem>>, vector<1x28x144xf32>
    %10 = vector.shape_cast %9 : vector<1x28x144xf32> to vector<28x144xf32>
    %cst_13 = arith.constant dense<0.000000e+00> : vector<56x144xf32>
    %11 = tpu.matmul %0, %10, %cst_13 {dimension_numbers = #tpu.dot_dimension_numbers<[1], [0], [0], [1], [0, 0, 1, 1], [], []>} : vector<56x28xf32>, vector<28x144xf32>, vector<56x144xf32> -> vector<56x144xf32>
    %cst_14 = arith.constant dense<0.000000e+00> : vector<48x144xf32>
    %12 = tpu.matmul %8, %11, %cst_14 {dimension_numbers = #tpu.dot_dimension_numbers<[1], [0], [0], [1], [0, 0, 1, 1], [], []>} : vector<48x56xf32>, vector<56x144xf32>, vector<48x144xf32> -> vector<48x144xf32>
    %13 = arith.addf %6, %12 : vector<48x144xf32>
    %c2 = arith.constant 2 : index
    %c0_15 = arith.constant 0 : index
    %c0_16 = arith.constant 0 : index
    %14 = vector.load %arg2[%c2, %c0_15, %c0_16] : memref<5x48x56xf32, #tpu.memory_space<vmem>>, vector<1x48x56xf32>
    %15 = vector.shape_cast %14 : vector<1x48x56xf32> to vector<48x56xf32>
    %c2_17 = arith.constant 2 : index
    %c0_18 = arith.constant 0 : index
    %c0_19 = arith.constant 0 : index
    %16 = vector.load %arg1[%c2_17, %c0_18, %c0_19] : memref<5x28x144xf32, #tpu.memory_space<vmem>>, vector<1x28x144xf32>
    %17 = vector.shape_cast %16 : vector<1x28x144xf32> to vector<28x144xf32>
    %cst_20 = arith.constant dense<0.000000e+00> : vector<56x144xf32>
    %18 = tpu.matmul %0, %17, %cst_20 {dimension_numbers = #tpu.dot_dimension_numbers<[1], [0], [0], [1], [0, 0, 1, 1], [], []>} : vector<56x28xf32>, vector<28x144xf32>, vector<56x144xf32> -> vector<56x144xf32>
    %cst_21 = arith.constant dense<0.000000e+00> : vector<48x144xf32>
    %19 = tpu.matmul %15, %18, %cst_21 {dimension_numbers = #tpu.dot_dimension_numbers<[1], [0], [0], [1], [0, 0, 1, 1], [], []>} : vector<48x56xf32>, vector<56x144xf32>, vector<48x144xf32> -> vector<48x144xf32>
    %20 = arith.addf %13, %19 : vector<48x144xf32>
    %c3 = arith.constant 3 : index
    %c0_22 = arith.constant 0 : index
    %c0_23 = arith.constant 0 : index
    %21 = vector.load %arg2[%c3, %c0_22, %c0_23] : memref<5x48x56xf32, #tpu.memory_space<vmem>>, vector<1x48x56xf32>
    %22 = vector.shape_cast %21 : vector<1x48x56xf32> to vector<48x56xf32>
    %c3_24 = arith.constant 3 : index
    %c0_25 = arith.constant 0 : index
    %c0_26 = arith.constant 0 : index
    %23 = vector.load %arg1[%c3_24, %c0_25, %c0_26] : memref<5x28x144xf32, #tpu.memory_space<vmem>>, vector<1x28x144xf32>
    %24 = vector.shape_cast %23 : vector<1x28x144xf32> to vector<28x144xf32>
    %cst_27 = arith.constant dense<0.000000e+00> : vector<56x144xf32>
    %25 = tpu.matmul %0, %24, %cst_27 {dimension_numbers = #tpu.dot_dimension_numbers<[1], [0], [0], [1], [0, 0, 1, 1], [], []>} : vector<56x28xf32>, vector<28x144xf32>, vector<56x144xf32> -> vector<56x144xf32>
    %cst_28 = arith.constant dense<0.000000e+00> : vector<48x144xf32>
    %26 = tpu.matmul %22, %25, %cst_28 {dimension_numbers = #tpu.dot_dimension_numbers<[1], [0], [0], [1], [0, 0, 1, 1], [], []>} : vector<48x56xf32>, vector<56x144xf32>, vector<48x144xf32> -> vector<48x144xf32>
    %27 = arith.addf %20, %26 : vector<48x144xf32>
    %c4 = arith.constant 4 : index
    %c0_29 = arith.constant 0 : index
    %c0_30 = arith.constant 0 : index
    %28 = vector.load %arg2[%c4, %c0_29, %c0_30] : memref<5x48x56xf32, #tpu.memory_space<vmem>>, vector<1x48x56xf32>
    %29 = vector.shape_cast %28 : vector<1x48x56xf32> to vector<48x56xf32>
    %c4_31 = arith.constant 4 : index
    %c0_32 = arith.constant 0 : index
    %c0_33 = arith.constant 0 : index
    %30 = vector.load %arg1[%c4_31, %c0_32, %c0_33] : memref<5x28x144xf32, #tpu.memory_space<vmem>>, vector<1x28x144xf32>
    %31 = vector.shape_cast %30 : vector<1x28x144xf32> to vector<28x144xf32>
    %cst_34 = arith.constant dense<0.000000e+00> : vector<56x144xf32>
    %32 = tpu.matmul %0, %31, %cst_34 {dimension_numbers = #tpu.dot_dimension_numbers<[1], [0], [0], [1], [0, 0, 1, 1], [], []>} : vector<56x28xf32>, vector<28x144xf32>, vector<56x144xf32> -> vector<56x144xf32>
    %cst_35 = arith.constant dense<0.000000e+00> : vector<48x144xf32>
    %33 = tpu.matmul %29, %32, %cst_35 {dimension_numbers = #tpu.dot_dimension_numbers<[1], [0], [0], [1], [0, 0, 1, 1], [], []>} : vector<48x56xf32>, vector<56x144xf32>, vector<48x144xf32> -> vector<48x144xf32>
    %34 = arith.addf %27, %33 : vector<48x144xf32>
    %c0_36 = arith.constant 0 : index
    %c0_37 = arith.constant 0 : index
    %35 = vector.load %arg3[%c0_36, %c0_37] : memref<1x144xf32, #tpu.memory_space<vmem>>, vector<1x144xf32>
    %36 = vector.broadcast %35 : vector<1x144xf32> to vector<48x144xf32>
    %37 = arith.addf %34, %36 : vector<48x144xf32>
    %cst_38 = arith.constant 0.000000e+00 : f32
    %38 = vector.broadcast %cst_38 : f32 to vector<48x144xf32>
    %39 = arith.maximumf %37, %38 : vector<48x144xf32>
    %c0_39 = arith.constant 0 : index
    %c0_40 = arith.constant 0 : index
    %c0_41 = arith.constant 0 : index
    %40 = vector.load %arg4[%c0_39, %c0_40, %c0_41] : memref<2x144x72xf32, #tpu.memory_space<vmem>>, vector<1x144x72xf32>
    %41 = vector.shape_cast %40 : vector<1x144x72xf32> to vector<144x72xf32>
    %cst_42 = arith.constant dense<0.000000e+00> : vector<48x72xf32>
    %42 = tpu.matmul %39, %41, %cst_42 {dimension_numbers = #tpu.dot_dimension_numbers<[1], [0], [0], [1], [0, 0, 1, 1], [], []>} : vector<48x144xf32>, vector<144x72xf32>, vector<48x72xf32> -> vector<48x72xf32>
    %c1_43 = arith.constant 1 : index
    %c0_44 = arith.constant 0 : index
    %c0_45 = arith.constant 0 : index
    %43 = vector.load %arg4[%c1_43, %c0_44, %c0_45] : memref<2x144x72xf32, #tpu.memory_space<vmem>>, vector<1x144x72xf32>
    %44 = vector.shape_cast %43 : vector<1x144x72xf32> to vector<144x72xf32>
    %cst_46 = arith.constant dense<0.000000e+00> : vector<48x72xf32>
    %45 = tpu.matmul %39, %44, %cst_46 {dimension_numbers = #tpu.dot_dimension_numbers<[1], [0], [0], [1], [0, 0, 1, 1], [], []>} : vector<48x144xf32>, vector<144x72xf32>, vector<48x72xf32> -> vector<48x72xf32>
    %46 = arith.maximumf %42, %45 : vector<48x72xf32>
    %c0_47 = arith.constant 0 : index
    %c0_48 = arith.constant 0 : index
    %c0_49 = arith.constant 0 : index
    %47 = vector.load %arg5[%c0_47, %c0_48, %c0_49] : memref<2x24x48xf32, #tpu.memory_space<vmem>>, vector<1x24x48xf32>
    %48 = vector.shape_cast %47 : vector<1x24x48xf32> to vector<24x48xf32>
    %cst_50 = arith.constant dense<0.000000e+00> : vector<24x72xf32>
    %49 = tpu.matmul %48, %46, %cst_50 {dimension_numbers = #tpu.dot_dimension_numbers<[1], [0], [0], [1], [0, 0, 1, 1], [], []>} : vector<24x48xf32>, vector<48x72xf32>, vector<24x72xf32> -> vector<24x72xf32>
    %c1_51 = arith.constant 1 : index
    %c0_52 = arith.constant 0 : index
    %c0_53 = arith.constant 0 : index
    %50 = vector.load %arg5[%c1_51, %c0_52, %c0_53] : memref<2x24x48xf32, #tpu.memory_space<vmem>>, vector<1x24x48xf32>
    %51 = vector.shape_cast %50 : vector<1x24x48xf32> to vector<24x48xf32>
    %cst_54 = arith.constant dense<0.000000e+00> : vector<24x72xf32>
    %52 = tpu.matmul %51, %46, %cst_54 {dimension_numbers = #tpu.dot_dimension_numbers<[1], [0], [0], [1], [0, 0, 1, 1], [], []>} : vector<24x48xf32>, vector<48x72xf32>, vector<24x72xf32> -> vector<24x72xf32>
    %53 = arith.maximumf %49, %52 : vector<24x72xf32>
    %c0_55 = arith.constant 0 : index
    %c0_56 = arith.constant 0 : index
    %c0_57 = arith.constant 0 : index
    %54 = vector.load %arg7[%c0_55, %c0_56, %c0_57] : memref<5x16x24xf32, #tpu.memory_space<vmem>>, vector<1x16x24xf32>
    %55 = vector.shape_cast %54 : vector<1x16x24xf32> to vector<16x24xf32>
    %c0_58 = arith.constant 0 : index
    %c0_59 = arith.constant 0 : index
    %c0_60 = arith.constant 0 : index
    %56 = vector.load %arg6[%c0_58, %c0_59, %c0_60] : memref<5x72x96xf32, #tpu.memory_space<vmem>>, vector<1x72x96xf32>
    %57 = vector.shape_cast %56 : vector<1x72x96xf32> to vector<72x96xf32>
    %cst_61 = arith.constant dense<0.000000e+00> : vector<24x96xf32>
    %58 = tpu.matmul %53, %57, %cst_61 {dimension_numbers = #tpu.dot_dimension_numbers<[1], [0], [0], [1], [0, 0, 1, 1], [], []>} : vector<24x72xf32>, vector<72x96xf32>, vector<24x96xf32> -> vector<24x96xf32>
    %cst_62 = arith.constant dense<0.000000e+00> : vector<16x96xf32>
    %59 = tpu.matmul %55, %58, %cst_62 {dimension_numbers = #tpu.dot_dimension_numbers<[1], [0], [0], [1], [0, 0, 1, 1], [], []>} : vector<16x24xf32>, vector<24x96xf32>, vector<16x96xf32> -> vector<16x96xf32>
    %c1_63 = arith.constant 1 : index
    %c0_64 = arith.constant 0 : index
    %c0_65 = arith.constant 0 : index
    %60 = vector.load %arg7[%c1_63, %c0_64, %c0_65] : memref<5x16x24xf32, #tpu.memory_space<vmem>>, vector<1x16x24xf32>
    %61 = vector.shape_cast %60 : vector<1x16x24xf32> to vector<16x24xf32>
    %c1_66 = arith.constant 1 : index
    %c0_67 = arith.constant 0 : index
    %c0_68 = arith.constant 0 : index
    %62 = vector.load %arg6[%c1_66, %c0_67, %c0_68] : memref<5x72x96xf32, #tpu.memory_space<vmem>>, vector<1x72x96xf32>
    %63 = vector.shape_cast %62 : vector<1x72x96xf32> to vector<72x96xf32>
    %cst_69 = arith.constant dense<0.000000e+00> : vector<24x96xf32>
    %64 = tpu.matmul %53, %63, %cst_69 {dimension_numbers = #tpu.dot_dimension_numbers<[1], [0], [0], [1], [0, 0, 1, 1], [], []>} : vector<24x72xf32>, vector<72x96xf32>, vector<24x96xf32> -> vector<24x96xf32>
    %cst_70 = arith.constant dense<0.000000e+00> : vector<16x96xf32>
    %65 = tpu.matmul %61, %64, %cst_70 {dimension_numbers = #tpu.dot_dimension_numbers<[1], [0], [0], [1], [0, 0, 1, 1], [], []>} : vector<16x24xf32>, vector<24x96xf32>, vector<16x96xf32> -> vector<16x96xf32>
    %66 = arith.addf %59, %65 : vector<16x96xf32>
    %c2_71 = arith.constant 2 : index
    %c0_72 = arith.constant 0 : index
    %c0_73 = arith.constant 0 : index
    %67 = vector.load %arg7[%c2_71, %c0_72, %c0_73] : memref<5x16x24xf32, #tpu.memory_space<vmem>>, vector<1x16x24xf32>
    %68 = vector.shape_cast %67 : vector<1x16x24xf32> to vector<16x24xf32>
    %c2_74 = arith.constant 2 : index
    %c0_75 = arith.constant 0 : index
    %c0_76 = arith.constant 0 : index
    %69 = vector.load %arg6[%c2_74, %c0_75, %c0_76] : memref<5x72x96xf32, #tpu.memory_space<vmem>>, vector<1x72x96xf32>
    %70 = vector.shape_cast %69 : vector<1x72x96xf32> to vector<72x96xf32>
    %cst_77 = arith.constant dense<0.000000e+00> : vector<24x96xf32>
    %71 = tpu.matmul %53, %70, %cst_77 {dimension_numbers = #tpu.dot_dimension_numbers<[1], [0], [0], [1], [0, 0, 1, 1], [], []>} : vector<24x72xf32>, vector<72x96xf32>, vector<24x96xf32> -> vector<24x96xf32>
    %cst_78 = arith.constant dense<0.000000e+00> : vector<16x96xf32>
    %72 = tpu.matmul %68, %71, %cst_78 {dimension_numbers = #tpu.dot_dimension_numbers<[1], [0], [0], [1], [0, 0, 1, 1], [], []>} : vector<16x24xf32>, vector<24x96xf32>, vector<16x96xf32> -> vector<16x96xf32>
    %73 = arith.addf %66, %72 : vector<16x96xf32>
    %c3_79 = arith.constant 3 : index
    %c0_80 = arith.constant 0 : index
    %c0_81 = arith.constant 0 : index
    %74 = vector.load %arg7[%c3_79, %c0_80, %c0_81] : memref<5x16x24xf32, #tpu.memory_space<vmem>>, vector<1x16x24xf32>
    %75 = vector.shape_cast %74 : vector<1x16x24xf32> to vector<16x24xf32>
    %c3_82 = arith.constant 3 : index
    %c0_83 = arith.constant 0 : index
    %c0_84 = arith.constant 0 : index
    %76 = vector.load %arg6[%c3_82, %c0_83, %c0_84] : memref<5x72x96xf32, #tpu.memory_space<vmem>>, vector<1x72x96xf32>
    %77 = vector.shape_cast %76 : vector<1x72x96xf32> to vector<72x96xf32>
    %cst_85 = arith.constant dense<0.000000e+00> : vector<24x96xf32>
    %78 = tpu.matmul %53, %77, %cst_85 {dimension_numbers = #tpu.dot_dimension_numbers<[1], [0], [0], [1], [0, 0, 1, 1], [], []>} : vector<24x72xf32>, vector<72x96xf32>, vector<24x96xf32> -> vector<24x96xf32>
    %cst_86 = arith.constant dense<0.000000e+00> : vector<16x96xf32>
    %79 = tpu.matmul %75, %78, %cst_86 {dimension_numbers = #tpu.dot_dimension_numbers<[1], [0], [0], [1], [0, 0, 1, 1], [], []>} : vector<16x24xf32>, vector<24x96xf32>, vector<16x96xf32> -> vector<16x96xf32>
    %80 = arith.addf %73, %79 : vector<16x96xf32>
    %c4_87 = arith.constant 4 : index
    %c0_88 = arith.constant 0 : index
    %c0_89 = arith.constant 0 : index
    %81 = vector.load %arg7[%c4_87, %c0_88, %c0_89] : memref<5x16x24xf32, #tpu.memory_space<vmem>>, vector<1x16x24xf32>
    %82 = vector.shape_cast %81 : vector<1x16x24xf32> to vector<16x24xf32>
    %c4_90 = arith.constant 4 : index
    %c0_91 = arith.constant 0 : index
    %c0_92 = arith.constant 0 : index
    %83 = vector.load %arg6[%c4_90, %c0_91, %c0_92] : memref<5x72x96xf32, #tpu.memory_space<vmem>>, vector<1x72x96xf32>
    %84 = vector.shape_cast %83 : vector<1x72x96xf32> to vector<72x96xf32>
    %cst_93 = arith.constant dense<0.000000e+00> : vector<24x96xf32>
    %85 = tpu.matmul %53, %84, %cst_93 {dimension_numbers = #tpu.dot_dimension_numbers<[1], [0], [0], [1], [0, 0, 1, 1], [], []>} : vector<24x72xf32>, vector<72x96xf32>, vector<24x96xf32> -> vector<24x96xf32>
    %cst_94 = arith.constant dense<0.000000e+00> : vector<16x96xf32>
    %86 = tpu.matmul %82, %85, %cst_94 {dimension_numbers = #tpu.dot_dimension_numbers<[1], [0], [0], [1], [0, 0, 1, 1], [], []>} : vector<16x24xf32>, vector<24x96xf32>, vector<16x96xf32> -> vector<16x96xf32>
    %87 = arith.addf %80, %86 : vector<16x96xf32>
    %c0_95 = arith.constant 0 : index
    %c0_96 = arith.constant 0 : index
    %88 = vector.load %arg8[%c0_95, %c0_96] : memref<1x96xf32, #tpu.memory_space<vmem>>, vector<1x96xf32>
    %89 = vector.broadcast %88 : vector<1x96xf32> to vector<16x96xf32>
    %90 = arith.addf %87, %89 : vector<16x96xf32>
    %cst_97 = arith.constant 0.000000e+00 : f32
    %91 = vector.broadcast %cst_97 : f32 to vector<16x96xf32>
    %92 = arith.maximumf %90, %91 : vector<16x96xf32>
    %c0_98 = arith.constant 0 : index
    %c0_99 = arith.constant 0 : index
    %c0_100 = arith.constant 0 : index
    %93 = vector.load %arg9[%c0_98, %c0_99, %c0_100] : memref<2x96x48xf32, #tpu.memory_space<vmem>>, vector<1x96x48xf32>
    %94 = vector.shape_cast %93 : vector<1x96x48xf32> to vector<96x48xf32>
    %cst_101 = arith.constant dense<0.000000e+00> : vector<16x48xf32>
    %95 = tpu.matmul %92, %94, %cst_101 {dimension_numbers = #tpu.dot_dimension_numbers<[1], [0], [0], [1], [0, 0, 1, 1], [], []>} : vector<16x96xf32>, vector<96x48xf32>, vector<16x48xf32> -> vector<16x48xf32>
    %c1_102 = arith.constant 1 : index
    %c0_103 = arith.constant 0 : index
    %c0_104 = arith.constant 0 : index
    %96 = vector.load %arg9[%c1_102, %c0_103, %c0_104] : memref<2x96x48xf32, #tpu.memory_space<vmem>>, vector<1x96x48xf32>
    %97 = vector.shape_cast %96 : vector<1x96x48xf32> to vector<96x48xf32>
    %cst_105 = arith.constant dense<0.000000e+00> : vector<16x48xf32>
    %98 = tpu.matmul %92, %97, %cst_105 {dimension_numbers = #tpu.dot_dimension_numbers<[1], [0], [0], [1], [0, 0, 1, 1], [], []>} : vector<16x96xf32>, vector<96x48xf32>, vector<16x48xf32> -> vector<16x48xf32>
    %99 = arith.maximumf %95, %98 : vector<16x48xf32>
    %c0_106 = arith.constant 0 : index
    %c0_107 = arith.constant 0 : index
    %c0_108 = arith.constant 0 : index
    %100 = vector.load %arg10[%c0_106, %c0_107, %c0_108] : memref<2x8x16xf32, #tpu.memory_space<vmem>>, vector<1x8x16xf32>
    %101 = vector.shape_cast %100 : vector<1x8x16xf32> to vector<8x16xf32>
    %cst_109 = arith.constant dense<0.000000e+00> : vector<8x48xf32>
    %102 = tpu.matmul %101, %99, %cst_109 {dimension_numbers = #tpu.dot_dimension_numbers<[1], [0], [0], [1], [0, 0, 1, 1], [], []>} : vector<8x16xf32>, vector<16x48xf32>, vector<8x48xf32> -> vector<8x48xf32>
    %c1_110 = arith.constant 1 : index
    %c0_111 = arith.constant 0 : index
    %c0_112 = arith.constant 0 : index
    %103 = vector.load %arg10[%c1_110, %c0_111, %c0_112] : memref<2x8x16xf32, #tpu.memory_space<vmem>>, vector<1x8x16xf32>
    %104 = vector.shape_cast %103 : vector<1x8x16xf32> to vector<8x16xf32>
    %cst_113 = arith.constant dense<0.000000e+00> : vector<8x48xf32>
    %105 = tpu.matmul %104, %99, %cst_113 {dimension_numbers = #tpu.dot_dimension_numbers<[1], [0], [0], [1], [0, 0, 1, 1], [], []>} : vector<8x16xf32>, vector<16x48xf32>, vector<8x48xf32> -> vector<8x48xf32>
    %106 = arith.maximumf %102, %105 : vector<8x48xf32>
    %c0_114 = arith.constant 0 : index
    %c0_115 = arith.constant 0 : index
    %c0_116 = arith.constant 0 : index
    %107 = vector.load %arg11[%c0_114, %c0_115, %c0_116] : memref<4x2x8xf32, #tpu.memory_space<vmem>>, vector<1x2x8xf32>
    %108 = vector.shape_cast %107 : vector<1x2x8xf32> to vector<2x8xf32>
    %cst_117 = arith.constant dense<0.000000e+00> : vector<2x48xf32>
    %109 = tpu.matmul %108, %106, %cst_117 {dimension_numbers = #tpu.dot_dimension_numbers<[1], [0], [0], [1], [0, 0, 1, 1], [], []>} : vector<2x8xf32>, vector<8x48xf32>, vector<2x48xf32> -> vector<2x48xf32>
    %c0_118 = arith.constant 0 : index
    %c0_119 = arith.constant 0 : index
    %c0_120 = arith.constant 0 : index
    %110 = vector.load %arg12[%c0_118, %c0_119, %c0_120] : memref<4x48x120xf32, #tpu.memory_space<vmem>>, vector<1x48x120xf32>
    %111 = vector.shape_cast %110 : vector<1x48x120xf32> to vector<48x120xf32>
    %cst_121 = arith.constant dense<0.000000e+00> : vector<2x120xf32>
    %112 = tpu.matmul %109, %111, %cst_121 {dimension_numbers = #tpu.dot_dimension_numbers<[1], [0], [0], [1], [0, 0, 1, 1], [], []>} : vector<2x48xf32>, vector<48x120xf32>, vector<2x120xf32> -> vector<2x120xf32>
    %c1_122 = arith.constant 1 : index
    %c0_123 = arith.constant 0 : index
    %c0_124 = arith.constant 0 : index
    %113 = vector.load %arg11[%c1_122, %c0_123, %c0_124] : memref<4x2x8xf32, #tpu.memory_space<vmem>>, vector<1x2x8xf32>
    %114 = vector.shape_cast %113 : vector<1x2x8xf32> to vector<2x8xf32>
    %cst_125 = arith.constant dense<0.000000e+00> : vector<2x48xf32>
    %115 = tpu.matmul %114, %106, %cst_125 {dimension_numbers = #tpu.dot_dimension_numbers<[1], [0], [0], [1], [0, 0, 1, 1], [], []>} : vector<2x8xf32>, vector<8x48xf32>, vector<2x48xf32> -> vector<2x48xf32>
    %c1_126 = arith.constant 1 : index
    %c0_127 = arith.constant 0 : index
    %c0_128 = arith.constant 0 : index
    %116 = vector.load %arg12[%c1_126, %c0_127, %c0_128] : memref<4x48x120xf32, #tpu.memory_space<vmem>>, vector<1x48x120xf32>
    %117 = vector.shape_cast %116 : vector<1x48x120xf32> to vector<48x120xf32>
    %cst_129 = arith.constant dense<0.000000e+00> : vector<2x120xf32>
    %118 = tpu.matmul %115, %117, %cst_129 {dimension_numbers = #tpu.dot_dimension_numbers<[1], [0], [0], [1], [0, 0, 1, 1], [], []>} : vector<2x48xf32>, vector<48x120xf32>, vector<2x120xf32> -> vector<2x120xf32>
    %119 = arith.addf %112, %118 : vector<2x120xf32>
    %c2_130 = arith.constant 2 : index
    %c0_131 = arith.constant 0 : index
    %c0_132 = arith.constant 0 : index
    %120 = vector.load %arg11[%c2_130, %c0_131, %c0_132] : memref<4x2x8xf32, #tpu.memory_space<vmem>>, vector<1x2x8xf32>
    %121 = vector.shape_cast %120 : vector<1x2x8xf32> to vector<2x8xf32>
    %cst_133 = arith.constant dense<0.000000e+00> : vector<2x48xf32>
    %122 = tpu.matmul %121, %106, %cst_133 {dimension_numbers = #tpu.dot_dimension_numbers<[1], [0], [0], [1], [0, 0, 1, 1], [], []>} : vector<2x8xf32>, vector<8x48xf32>, vector<2x48xf32> -> vector<2x48xf32>
    %c2_134 = arith.constant 2 : index
    %c0_135 = arith.constant 0 : index
    %c0_136 = arith.constant 0 : index
    %123 = vector.load %arg12[%c2_134, %c0_135, %c0_136] : memref<4x48x120xf32, #tpu.memory_space<vmem>>, vector<1x48x120xf32>
    %124 = vector.shape_cast %123 : vector<1x48x120xf32> to vector<48x120xf32>
    %cst_137 = arith.constant dense<0.000000e+00> : vector<2x120xf32>
    %125 = tpu.matmul %122, %124, %cst_137 {dimension_numbers = #tpu.dot_dimension_numbers<[1], [0], [0], [1], [0, 0, 1, 1], [], []>} : vector<2x48xf32>, vector<48x120xf32>, vector<2x120xf32> -> vector<2x120xf32>
    %126 = arith.addf %119, %125 : vector<2x120xf32>
    %c3_138 = arith.constant 3 : index
    %c0_139 = arith.constant 0 : index
    %c0_140 = arith.constant 0 : index
    %127 = vector.load %arg11[%c3_138, %c0_139, %c0_140] : memref<4x2x8xf32, #tpu.memory_space<vmem>>, vector<1x2x8xf32>
    %128 = vector.shape_cast %127 : vector<1x2x8xf32> to vector<2x8xf32>
    %cst_141 = arith.constant dense<0.000000e+00> : vector<2x48xf32>
    %129 = tpu.matmul %128, %106, %cst_141 {dimension_numbers = #tpu.dot_dimension_numbers<[1], [0], [0], [1], [0, 0, 1, 1], [], []>} : vector<2x8xf32>, vector<8x48xf32>, vector<2x48xf32> -> vector<2x48xf32>
    %c3_142 = arith.constant 3 : index
    %c0_143 = arith.constant 0 : index
    %c0_144 = arith.constant 0 : index
    %130 = vector.load %arg12[%c3_142, %c0_143, %c0_144] : memref<4x48x120xf32, #tpu.memory_space<vmem>>, vector<1x48x120xf32>
    %131 = vector.shape_cast %130 : vector<1x48x120xf32> to vector<48x120xf32>
    %cst_145 = arith.constant dense<0.000000e+00> : vector<2x120xf32>
    %132 = tpu.matmul %129, %131, %cst_145 {dimension_numbers = #tpu.dot_dimension_numbers<[1], [0], [0], [1], [0, 0, 1, 1], [], []>} : vector<2x48xf32>, vector<48x120xf32>, vector<2x120xf32> -> vector<2x120xf32>
    %133 = arith.addf %126, %132 : vector<2x120xf32>
    %c0_146 = arith.constant 0 : index
    %c0_147 = arith.constant 0 : index
    %134 = vector.load %arg13[%c0_146, %c0_147] : memref<1x120xf32, #tpu.memory_space<vmem>>, vector<1x120xf32>
    %135 = vector.broadcast %134 : vector<1x120xf32> to vector<2x120xf32>
    %136 = arith.addf %133, %135 : vector<2x120xf32>
    %cst_148 = arith.constant 0.000000e+00 : f32
    %137 = vector.broadcast %cst_148 : f32 to vector<2x120xf32>
    %138 = arith.maximumf %136, %137 : vector<2x120xf32>
    %c0_149 = arith.constant 0 : index
    %c0_150 = arith.constant 0 : index
    %139 = vector.load %arg14[%c0_149, %c0_150] : memref<120x60xf32, #tpu.memory_space<vmem>>, vector<120x60xf32>
    %cst_151 = arith.constant dense<0.000000e+00> : vector<2x60xf32>
    %140 = tpu.matmul %138, %139, %cst_151 {dimension_numbers = #tpu.dot_dimension_numbers<[1], [0], [0], [1], [0, 0, 1, 1], [], []>} : vector<2x120xf32>, vector<120x60xf32>, vector<2x60xf32> -> vector<2x60xf32>
    %c0_152 = arith.constant 0 : index
    %c0_153 = arith.constant 0 : index
    %141 = vector.load %arg15[%c0_152, %c0_153] : memref<1x60xf32, #tpu.memory_space<vmem>>, vector<1x60xf32>
    %142 = vector.broadcast %141 : vector<1x60xf32> to vector<2x60xf32>
    %143 = arith.addf %140, %142 : vector<2x60xf32>
    %cst_154 = arith.constant 0.000000e+00 : f32
    %144 = vector.broadcast %cst_154 : f32 to vector<2x60xf32>
    %145 = arith.maximumf %143, %144 : vector<2x60xf32>
    %c0_155 = arith.constant 0 : index
    %c0_156 = arith.constant 0 : index
    %146 = vector.load %arg16[%c0_155, %c0_156] : memref<60x10xf32, #tpu.memory_space<vmem>>, vector<60x10xf32>
    %cst_157 = arith.constant dense<0.000000e+00> : vector<2x10xf32>
    %147 = tpu.matmul %145, %146, %cst_157 {dimension_numbers = #tpu.dot_dimension_numbers<[1], [0], [0], [1], [0, 0, 1, 1], [], []>} : vector<2x60xf32>, vector<60x10xf32>, vector<2x10xf32> -> vector<2x10xf32>
    %c0_158 = arith.constant 0 : index
    %c0_159 = arith.constant 0 : index
    %148 = vector.load %arg17[%c0_158, %c0_159] : memref<1x10xf32, #tpu.memory_space<vmem>>, vector<1x10xf32>
    %149 = vector.broadcast %148 : vector<1x10xf32> to vector<2x10xf32>
    %150 = arith.addf %147, %149 : vector<2x10xf32>
    %c0_160 = arith.constant 0 : index
    %c0_161 = arith.constant 0 : index
    %151 = vector.load %arg18[%c0_160, %c0_161] : memref<2x10xf32, #tpu.memory_space<vmem>>, vector<2x10xf32>
    tpu.vector_store %arg18[%c0_160, %c0_161], %150 {strides = array<i32>} : memref<2x10xf32, #tpu.memory_space<vmem>>, vector<2x10xf32>,
    return
  }
}

</mosaic_0001>

<bundles_post_ra>
// kernel: network_forward.1
= control target key start
LH: loop header
LB: loop body
LE: loop exit
PB: predicated region body
PF: predicated region fallthrough
CT: control target
= control target key end

     0   :  { %s6221_s0 = inlined_call_operand.hbm [shape: f32[56,28], index: 0, kind: input, shape index: {}]   ;;  %s6222_s1 = inlined_call_operand.hbm [shape: f32[5,28,144], index: 1, kind: input, shape index: {}]   ;;  %s6223_s2 = inlined_call_operand.hbm [shape: f32[5,48,56], index: 2, kind: input, shape index: {}]   ;;  %s6224_s3 = inlined_call_operand.vmem [shape: f32[1,144], index: 3, kind: input, shape index: {}]   ;;  %s6225_s4 = inlined_call_operand.hbm [shape: f32[2,144,72], index: 4, kind: input, shape index: {}]   ;;  %s6226_s5 = inlined_call_operand.hbm [shape: f32[2,24,48], index: 5, kind: input, shape index: {}]   ;;  %s6227_s6 = inlined_call_operand.vmem [shape: f32[5,72,96], index: 6, kind: input, shape index: {}]   ;;  %s6228_s7 = inlined_call_operand.hbm [shape: f32[5,16,24], index: 7, kind: input, shape index: {}]   ;;  %s6229_s8 = inlined_call_operand.vmem [shape: f32[1,96], index: 8, kind: input, shape index: {}]   ;;  %s6230_s9 = inlined_call_operand.vmem [shape: f32[2,96,48], index: 9, kind: input, shape index: {}]   ;;  %s6231_s10 = inlined_call_operand.hbm [shape: f32[2,8,16], index: 10, kind: input, shape index: {}]   ;;  %s6232_s11 = inlined_call_operand.vmem [shape: f32[4,2,8], index: 11, kind: input, shape index: {}]   ;;  %s6233_s12 = inlined_call_operand.vmem [shape: f32[4,48,120], index: 12, kind: input, shape index: {}]   ;;  %s6234_s13 = inlined_call_operand.vmem [shape: f32[1,120], index: 13, kind: input, shape index: {}]   ;;  %s6235_s14 = inlined_call_operand.vmem [shape: f32[120,60], index: 14, kind: input, shape index: {}]   ;;  %s6236_s15 = inlined_call_operand.hbm [shape: f32[1,60], index: 15, kind: input, shape index: {}]   ;;  %s6237_s16 = inlined_call_operand.vmem [shape: f32[60,10], index: 16, kind: input, shape index: {}]   ;;  %s6238_s17 = inlined_call_operand.hbm [shape: f32[1,10], index: 17, kind: input, shape index: {}]   ;;  %s6239_s18 = inlined_call_operand.hbm [shape: f32[2,10], index: 18, kind: output, shape index: {}]  }
   0x1   :  { %6240 = sst [smem:[#allocation24_spill]] %s6221_s0 }
   0x2   :  { %6241 = sst [smem:[#allocation25_spill]] %s6222_s1 }
   0x3   :  { %6242 = sst [smem:[#allocation26_spill]] %s6223_s2 }
   0x4   :  { %23 = vsyncpa [#allocation3], 0 }
   0x5   :  { %24 = vsyncpa [#allocation6], 0 }
   0x6   :  { %25 = vsyncpa [#allocation9], 0 }
   0x7   :  { %26 = vsyncpa [#allocation12], 0 }
   0x8   :  { %27 = vsyncpa [#allocation15], 0 }
   0x9   :  { %28 = vsyncpa [#allocation4], 0  ;;  %s5086_s27 = smov [#allocation5]  }
   0xa   :  { %s46_s28 = sshll.u32 %s5086_s27, 4  ;;  %s47_s28 = int_to_ptr.vmem [resolvable:$true] %s46_s28 }
   0xb   :  { %s4882_s29 = scalar_lea.vmem %s47_s28, 5120  ;;  %p4887_p1 = scmp.lt.s32.totalorder %s47_s28, %s47_s28 }
   0xc   :  { %p4883_p0 = scmp.ne.s32.totalorder %s47_s28, %s4882_s29  ;;  %p4888_p2 = scmp.lt.s32.totalorder %s4882_s29, %s4882_s29 }
   0xe   :  { %p4889_p3 = por %p4888_p2, %p4887_p1 }
  0x10   :  { %p4890_p4 = pnand %p4889_p3, %p4883_p0 }
  0x12   :  { %4893 = shalt.err (!%p4890_p4)
}
  0x13   :  { %s5087_s30 = smov 256   ;;  %s5088_s0 = smov 16  }
  0x14   :  { %s6243_s20 = sld [smem:[#allocation25_spill]]  ;;  %s5089_s21 = smov [#allocation8]  }
  0x15   :  { %s72_s22 = sshll.u32 %s5089_s21, 4  ;;  %s5090_s2 = smov [#allocation11]   ;;  %s73_s22 = int_to_ptr.vmem [resolvable:$true] %s72_s22 }
  0x16   :  { %s98_s23 = sshll.u32 %s5090_s2, 4  ;;  %s4902_s24 = scalar_lea.vmem %s73_s22, 4608  ;;  %s99_s23 = int_to_ptr.vmem [resolvable:$true] %s98_s23 }
  0x17   :  { %p4903_p5 = scmp.ne.s32.totalorder %s73_s22, %s4902_s24  ;;  %p4907_p6 = scmp.lt.s32.totalorder %s73_s22, %s73_s22 }
  0x18   :  { %p4908_p7 = scmp.lt.s32.totalorder %s4902_s24, %s4902_s24 }
  0x1a   :  { %52 = dma.hbm_to_vmem [thread:$0]  %s6243_s20, 5120, %s47_s28, [#allocation6], %s5087_s30, %s5087_s30, %s5088_s0  }
  0x1b   :  { %p4909_p8 = por %p4908_p7, %p4907_p6 }
  0x1d   :  { %p4910_p9 = pnand %p4909_p8, %p4903_p5 }
  0x1f   :  { %4913 = shalt.err (!%p4910_p9)
}
  0x20   :  { %s5091_s25 = smov 128   ;;  %s5092_s26 = smov 8  }
  0x21   :  { %78 = dma.hbm_to_vmem [thread:$0]  %s6225_s4, 4608, %s73_s22, [#allocation9], %s5091_s25, %s5091_s25, %s5092_s26  }
  0x22   :  { %s4922_s28 = scalar_lea.vmem %s99_s23, 1280  ;;  %p4927_p11 = scmp.lt.s32.totalorder %s99_s23, %s99_s23 }
  0x23   :  { %p4923_p10 = scmp.ne.s32.totalorder %s99_s23, %s4922_s28  ;;  %p4928_p12 = scmp.lt.s32.totalorder %s4922_s28, %s4922_s28 }
  0x25   :  { %p4929_p13 = por %p4928_p12, %p4927_p11 }
  0x27   :  { %p4930_p0 = pnand %p4929_p13, %p4923_p10 }
  0x29   :  { %4933 = shalt.err (!%p4930_p0)
}
  0x2a   :  { %104 = dma.hbm_to_vmem [thread:$0]  %s6228_s7, 1280, %s99_s23, [#allocation12], %s5091_s25, %s5091_s25, %s5092_s26  }
  0x2b   :  { %s5093_s19 = smov [#allocation14]   ;;  %s5094_s20 = smov [#allocation2]  }
  0x2c   :  { %s135_s1 = sshll.u32 %s5093_s19, 4  ;;  %s34_s4 = sshll.u32 %s5094_s20, 4  ;;  %s136_s1 = int_to_ptr.vmem [resolvable:$true] %s135_s1  ;;  %s35_s4 = int_to_ptr.vmem [resolvable:$true] %s34_s4 }
  0x2d   :  { %s4942_s21 = scalar_lea.vmem %s136_s1, 16  ;;  %s4946_s22 = scalar_lea.vmem %s136_s1, 32 }
  0x2e   :  { %p4943_p1 = scmp.ne.s32.totalorder %s136_s1, %s4942_s21  ;;  %p4947_p2 = scmp.lt.s32.totalorder %s136_s1, %s136_s1 }
  0x2f   :  { %p4948_p3 = scmp.lt.s32.totalorder %s4946_s22, %s4942_s21 }
  0x31   :  { %p4949_p4 = por %p4948_p3, %p4947_p2 }
  0x33   :  { %p4950_p5 = pnand %p4949_p4, %p4943_p1 }
  0x35   :  { %4953 = shalt.err (!%p4950_p5)
}
  0x36   :  { %138 = dma.hbm_to_vmem [thread:$0]  %s6236_s15, 16, %s136_s1, [#allocation15]  }
  0x37   :  { %s4962_s27 = scalar_lea.vmem %s35_s4, 896  ;;  %p4967_p7 = scmp.lt.s32.totalorder %s35_s4, %s35_s4 }
  0x38   :  { %p4963_p6 = scmp.ne.s32.totalorder %s35_s4, %s4962_s27  ;;  %p4968_p8 = scmp.lt.s32.totalorder %s4962_s27, %s4962_s27 }
  0x3a   :  { %p4969_p9 = por %p4968_p8, %p4967_p7 }
  0x3c   :  { %p4970_p10 = pnand %p4969_p9, %p4963_p6 }
  0x3e   :  { %4973 = shalt.err (!%p4970_p10)
}
  0x3f   :  { %s6244_s29 = sld [smem:[#allocation24_spill]]  ;;  %s5095_s28 = smov [#allocation7]  }
  0x40   :  { %s58_s30 = sshll.u32 %s5095_s28, 4  ;;  %s5096_s0 = smov [#allocation10]   ;;  %s59_s30 = int_to_ptr.vmem [resolvable:$true] %s58_s30 }
  0x41   :  { %s84_s15 = sshll.u32 %s5096_s0, 4  ;;  %s4982_s19 = scalar_lea.vmem %s59_s30, 3840  ;;  %s85_s15 = int_to_ptr.vmem [resolvable:$true] %s84_s15 }
  0x42   :  { %p4983_p11 = scmp.ne.s32.totalorder %s59_s30, %s4982_s19  ;;  %p4987_p12 = scmp.lt.s32.totalorder %s59_s30, %s59_s30 }
  0x43   :  { %p4988_p13 = scmp.lt.s32.totalorder %s4982_s19, %s4982_s19 }
  0x45   :  { %40 = dma.hbm_to_vmem [thread:$0]  %s6244_s29, 896, %s35_s4, [#allocation3], %s5091_s25, %s5091_s25, %s5092_s26  }
  0x46   :  { %p4989_p0 = por %p4988_p13, %p4987_p12 }
  0x48   :  { %p4990_p1 = pnand %p4989_p0, %p4983_p11 }
  0x4a   :  { %4993 = shalt.err (!%p4990_p1)
}
  0x4b   :  { %s6245_s21 = sld [smem:[#allocation26_spill]]  ;;  %s5002_s4 = scalar_lea.vmem %s85_s15, 768 }
  0x4c   :  { %p5003_p2 = scmp.ne.s32.totalorder %s85_s15, %s5002_s4  ;;  %p5007_p3 = scmp.lt.s32.totalorder %s85_s15, %s85_s15 }
  0x4d   :  { %p5008_p4 = scmp.lt.s32.totalorder %s5002_s4, %s5002_s4 }
  0x4f   :  { %p5009_p5 = por %p5008_p4, %p5007_p3 }
  0x51   :  { %64 = dma.hbm_to_vmem [thread:$0]  %s6245_s21, 3840, %s59_s30, [#allocation6], %s5091_s25, %s5091_s25, %s5092_s26  }
  0x52   :  { %p5010_p6 = pnand %p5009_p5, %p5003_p2 }
  0x54   :  { %5013 = shalt.err (!%p5010_p6)
}
  0x55   :  { %90 = dma.hbm_to_vmem [thread:$0]  %s6226_s5, 768, %s85_s15, [#allocation9], %s5091_s25, %s5091_s25, %s5092_s26  }
  0x56   :  { %s5097_s24 = smov [#allocation13]   ;;  %s5098_s7 = smov [#allocation16]  }
  0x57   :  { %s114_s27 = sshll.u32 %s5097_s24, 4  ;;  %s147_s23 = sshll.u32 %s5098_s7, 4  ;;  %s115_s27 = int_to_ptr.vmem [resolvable:$true] %s114_s27  ;;  %s148_s23 = int_to_ptr.vmem [resolvable:$true] %s147_s23 }
  0x58   :  { %s5022_s29 = scalar_lea.vmem %s115_s27, 256  ;;  %p5027_p8 = scmp.lt.s32.totalorder %s115_s27, %s115_s27 }
  0x59   :  { %p5023_p7 = scmp.ne.s32.totalorder %s115_s27, %s5022_s29  ;;  %p5028_p9 = scmp.lt.s32.totalorder %s5022_s29, %s5022_s29 }
  0x5b   :  { %p5029_p10 = por %p5028_p9, %p5027_p8 }
  0x5d   :  { %p5030_p11 = pnand %p5029_p10, %p5023_p7 }
  0x5f   :  { %5033 = shalt.err (!%p5030_p11)
}
  0x60   :  { %120 = dma.hbm_to_vmem [thread:$0]  %s6231_s10, 256, %s115_s27, [#allocation12], %s5091_s25, %s5091_s25, %s5092_s26  }
  0x61   :  { %s5042_s5 = scalar_lea.vmem %s148_s23, 16  ;;  %s5046_s0 = scalar_lea.vmem %s148_s23, 32 }
  0x62   :  { %p5043_p12 = scmp.ne.s32.totalorder %s148_s23, %s5042_s5  ;;  %p5047_p13 = scmp.lt.s32.totalorder %s148_s23, %s148_s23 }
  0x63   :  { %p5048_p0 = scmp.lt.s32.totalorder %s5046_s0, %s5042_s5 }
  0x65   :  { %p5049_p1 = por %p5048_p0, %p5047_p13 }
  0x67   :  { %p5050_p2 = pnand %p5049_p1, %p5043_p12 }
  0x69   :  { %5053 = shalt.err (!%p5050_p2)
}
  0x6a   :  { %150 = dma.hbm_to_vmem [thread:$0]  %s6238_s17, 16, %s148_s23, [#allocation15]  }
  0x6b   :  { %5074 = dma.done.wait [#allocation3], 896  }
  0x6c   :  { %5075 = vsyncadd [#allocation3], 4294966400 }
  0x6d   :  { %5076 = dma.done.wait [#allocation6], 8960  }
  0x6e   :  { %5077 = vsyncadd [#allocation6], 4294958336 }
  0x6f   :  { %5078 = dma.done.wait [#allocation9], 5376  }
  0x70   :  { %5079 = vsyncadd [#allocation9], 4294961920 }
  0x71   :  { %5080 = dma.done.wait [#allocation12], 1536  }
  0x72   :  { %5081 = vsyncadd [#allocation12], 4294965760 }
  0x73   :  { %5082 = dma.done.wait [#allocation15], 32  }
  0x74   :  { %5083 = vsyncadd [#allocation15], 4294967264  ;;  %v5099_v0 = vmov 0.0   ;;  %vm221_vm0 = vcmask 1043456   ;;  %v198_v1 = vld [vmem:[#allocation5 + $0x38] sm:$0xf] }
  0x75   :  { %292 = vmatprep.mubr.f32.mxu0 %v5099_v0  ;;  %421 = vmatprep.mubr.f32.mxu1 %v5099_v0  ;;  %v350_v2 = vld [vmem:[#allocation5 + $0x78] sm:$0xf]  ;;  %v197_v3 = vld [vmem:[#allocation5 + $0x30] sm:$0xf]  ;;  %v196_v5 = vld [vmem:[#allocation5 + $0x28] sm:$0xff]  ;;  %vm199_vm1 = vcmask 228352  }
  0x76   :  { %4030 = vmatprep.subr.msk.mxu0 %vm221_vm0, %v198_v1  ;;  %4039 = vmatprep.subr.msk.mxu1 %vm221_vm0, %v350_v2  ;;  %v349_v4 = vld [vmem:[#allocation5 + $0x70] sm:$0xf]  ;;  %v348_v6 = vld [vmem:[#allocation5 + $0x68] sm:$0xff]  ;;  %v195_v7 = vld [vmem:[#allocation5 + $0x20] sm:$0xff]  ;;  %vm464_vm2 = vcmask 457728   ;;  %vm1537_vm3 = vcmask 130048  }
  0x77   :  { %4031 = vmatpush1.msk.msra.mxu0 %vm221_vm0, %v197_v3  ;;  %4040 = vmatpush1.msk.msra.mxu1 %vm221_vm0, %v349_v4  ;;  %v347_v8 = vld [vmem:[#allocation5 + $0x60] sm:$0xff]  ;;  %v194_v9 = vld [vmem:[#allocation5 + $0x18] sm:$0xff]  ;;  %v193_v11 = vld [vmem:[#allocation5 + $0x10] sm:$0xff]  ;;  %vm5100_vm4 = vmmov 0   ;;  %vm1774_vm5 = vcmask 392192   ;;  %vm1971_vm6 = vcmask 588800  }
  0x78   :  { %254 = vmatprep.subr.mxu0 %v196_v5  ;;  %383 = vmatprep.subr.mxu1 %v348_v6  ;;  %v346_v10 = vld [vmem:[#allocation5 + $0x58] sm:$0xff]  ;;  %v345_v12 = vld [vmem:[#allocation5 + $0x50] sm:$0xff]  ;;  %v192_v13 = vld [vmem:[#allocation5 + $0x8] sm:$0xff]  ;;  %vm2154_vm7 = vcmask 195584   ;;  %vm2868_vm8 = vcmask 785408   ;;  %vm3191_vm9 = vcmask 64512  }
  0x79   :  { %255 = vmatpush1.msra.mxu0 %v195_v7  ;;  %384 = vmatpush1.msra.mxu1 %v347_v8  ;;  %v344_v14 = vld [vmem:[#allocation5 + $0x48] sm:$0xff]  ;;  %v191_v15 = vld [vmem:[#allocation5] sm:$0xff]  ;;  %v5256_v18 = vld [vmem:[#allocation2 + $0x8] sm:$0xff]  ;;  %vm3842_vm10 = vcmask 982016   ;;  %vm3932_vm11 = vcmask 490496   ;;  %s5101_s26 = smov [#allocation17]  }
  0x7a   :  { %256 = vmatprep.subr.mxu0 %v194_v9  ;;  %385 = vmatprep.subr.mxu1 %v346_v10  ;;  %v343_v16 = vld [vmem:[#allocation5 + $0x40] sm:$0xff]  ;;  %v5248_v17 = vld [vmem:[#allocation2] sm:$0xff]  ;;  %v5264_v19 = vld [vmem:[#allocation2 + $0x10] sm:$0xff]  ;;  %s4017_s1 = sshll.u32 %s5101_s26, 4  ;;  %vm4009_vm12 = vcmask 74752   ;;  %s4018_s1 = int_to_ptr.vmem [resolvable:$true] %s4017_s1 }
  0x7b   :  { %257 = vmatpush1.msra.mxu0 %v193_v11  ;;  %386 = vmatpush1.msra.mxu1 %v345_v12  ;;  %v5272_v20 = vld [vmem:[#allocation2 + $0x18] sm:$0xff]  ;;  %v5280_v21 = vld [vmem:[#allocation2 + $0x20] sm:$0xff]  ;;  %v5288_v22 = vld [vmem:[#allocation2 + $0x28] sm:$0xff]  ;;  %p5059_p4 = scmp.lt.s32.totalorder %s4018_s1, %s4018_s1 }
  0x7c   :  { %258 = vmatprep.subr.mxu0 %v192_v13  ;;  %387 = vmatprep.subr.mxu1 %v344_v14  ;;  %v5296_v23 = vld [vmem:[#allocation2 + $0x30] sm:$0xff]  ;;  %v336_v52 = vld [vmem:[#allocation7 + $0x30] sm:$0xff]  ;;  %v185_v53 = vld [vmem:[#allocation7] sm:$0xff] }
  0x7d   :  { %259 = vmatpush1.msra.mxu0 %v191_v15  ;;  %388 = vmatpush1.msra.mxu1 %v343_v16  ;;  %v718_v54 = vld [vmem:[#allocation5 + $0xb8] sm:$0xf]  ;;  %v717_v55 = vld [vmem:[#allocation5 + $0xb0] sm:$0xf]  ;;  %v186_v57 = vld [vmem:[#allocation7 + $0x8] sm:$0xff] }
  0x7e   :  { %4032 = vmatmul.mubr.msk.f32.vlgmr.msra.gmra.mxu0 %vm199_vm1, %v5248_v17  ;;  %4041 = vmatmul.mubr.msk.f32.vlgmr.msra.gmra.mxu1 %vm199_vm1, %v5248_v17  ;;  %v337_v56 = vld [vmem:[#allocation7 + $0x38] sm:$0xff]  ;;  %v716_v58 = vld [vmem:[#allocation5 + $0xa8] sm:$0xff]  ;;  %v715_v59 = vld [vmem:[#allocation5 + $0xa0] sm:$0xff] }
  0x7f   :  { %298 = vmatprep.mubr.f32.mxu0 %v5099_v0  ;;  %427 = vmatprep.mubr.f32.mxu1 %v5099_v0  ;;  %v338_v60 = vld [vmem:[#allocation7 + $0x40] sm:$0xff]  ;;  %v187_v61 = vld [vmem:[#allocation7 + $0x10] sm:$0xff]  ;;  %v714_v62 = vld [vmem:[#allocation5 + $0x98] sm:$0xff] }
  0x80   :  { %v713_v63 = vld [vmem:[#allocation5 + $0x90] sm:$0xff]  ;;  %v339_v1 = vld [vmem:[#allocation7 + $0x48] sm:$0xff]  ;;  %v188_v2 = vld [vmem:[#allocation7 + $0x18] sm:$0xff] }
  0x81   :  { %v712_v3 = vld [vmem:[#allocation5 + $0x88] sm:$0xff]  ;;  %v711_v4 = vld [vmem:[#allocation5 + $0x80] sm:$0xff]  ;;  %v340_v5 = vld [vmem:[#allocation7 + $0x50] sm:$0xff] }
  0x82   :  { %4033 = vmatmul.mubr.msk.f32.gmra.mxu0 %vm199_vm1, %v5256_v18  ;;  %4042 = vmatmul.mubr.msk.f32.gmra.mxu1 %vm199_vm1, %v5256_v18  ;;  %v189_v6 = vld [vmem:[#allocation7 + $0x20] sm:$0xff]  ;;  %v341_v7 = vld [vmem:[#allocation7 + $0x58] sm:$0xff]  ;;  %v190_v8 = vld [vmem:[#allocation7 + $0x28] sm:$0xff] }
  0x83   :  { %304 = vmatprep.mubr.f32.mxu0 %v5099_v0  ;;  %433 = vmatprep.mubr.f32.mxu1 %v5099_v0 }
  0x86   :  { %4034 = vmatmul.mubr.msk.f32.gmra.mxu0 %vm199_vm1, %v5264_v19  ;;  %4043 = vmatmul.mubr.msk.f32.gmra.mxu1 %vm199_vm1, %v5264_v19 }
  0x87   :  { %310 = vmatprep.mubr.f32.mxu0 %v5099_v0  ;;  %439 = vmatprep.mubr.f32.mxu1 %v5099_v0 }
  0x8a   :  { %4035 = vmatmul.mubr.msk.f32.gmra.mxu0 %vm199_vm1, %v5272_v20  ;;  %4044 = vmatmul.mubr.msk.f32.gmra.mxu1 %vm199_vm1, %v5272_v20 }
  0x8b   :  { %316 = vmatprep.mubr.f32.mxu0 %v5099_v0  ;;  %445 = vmatprep.mubr.f32.mxu1 %v5099_v0 }
  0x8e   :  { %4036 = vmatmul.mubr.msk.f32.gmra.mxu0 %vm199_vm1, %v5280_v21  ;;  %4045 = vmatmul.mubr.msk.f32.gmra.mxu1 %vm199_vm1, %v5280_v21 }
  0x8f   :  { %322 = vmatprep.mubr.f32.mxu0 %v5099_v0  ;;  %451 = vmatprep.mubr.f32.mxu1 %v5099_v0 }
  0x92   :  { %4037 = vmatmul.mubr.msk.f32.gmra.mxu0 %vm199_vm1, %v5288_v22  ;;  %4046 = vmatmul.mubr.msk.f32.gmra.mxu1 %vm199_vm1, %v5288_v22 }
  0x93   :  { %328 = vmatprep.mubr.f32.mxu0 %v5099_v0  ;;  %457 = vmatprep.mubr.f32.mxu1 %v5099_v0 }
  0x96   :  { %4038 = vmatmul.mubr.msk.f32.gmra.mxu0 %vm199_vm1, %v5296_v23  ;;  %4047 = vmatmul.mubr.msk.f32.gmra.mxu1 %vm199_vm1, %v5296_v23 }
  0x97   :  { %547 = vmatprep.mubr.f32.mxu0 %v5099_v0  ;;  %666 = vmatprep.mubr.f32.mxu1 %v5099_v0 }
 0x13e   :  { %v294_v24 = vpop.f32.mrf.mxu0  ;;  %v423_v25 = vpop.f32.mrf.mxu1 }
 0x140   :  { %v296_v26 = vpop.f32.mrf.mxu0  ;;  %v425_v27 = vpop.f32.mrf.mxu1 }
 0x142   :  { %v300_v28 = vpop.f32.mrf.mxu0  ;;  %v429_v29 = vpop.f32.mrf.mxu1 }
 0x144   :  { %v302_v30 = vpop.f32.mrf.mxu0  ;;  %v431_v31 = vpop.f32.mrf.mxu1 }
 0x146   :  { %v306_v32 = vpop.f32.mrf.mxu0  ;;  %v435_v33 = vpop.f32.mrf.mxu1 }
 0x148   :  { %v308_v34 = vpop.f32.mrf.mxu0  ;;  %v437_v35 = vpop.f32.mrf.mxu1 }
 0x14a   :  { %v312_v36 = vpop.f32.mrf.mxu0  ;;  %v441_v37 = vpop.f32.mrf.mxu1 }
 0x14c   :  { %v314_v38 = vpop.f32.mrf.mxu0  ;;  %v443_v39 = vpop.f32.mrf.mxu1 }
 0x14e   :  { %v318_v40 = vpop.f32.mrf.mxu0  ;;  %v447_v41 = vpop.f32.mrf.mxu1 }
 0x150   :  { %v320_v42 = vpop.f32.mrf.mxu0  ;;  %v449_v43 = vpop.f32.mrf.mxu1 }
 0x152   :  { %v324_v44 = vpop.f32.mrf.mxu0  ;;  %v453_v45 = vpop.f32.mrf.mxu1 }
 0x154   :  { %v326_v46 = vpop.f32.mrf.mxu0  ;;  %v455_v47 = vpop.f32.mrf.mxu1 }
 0x156   :  { %v330_v48 = vpop.f32.mrf.mxu0  ;;  %v459_v49 = vpop.f32.mrf.mxu1 }
 0x158   :  { %v332_v50 = vpop.f32.mrf.mxu0  ;;  %v461_v51 = vpop.f32.mrf.mxu1 }
 0x159   :  { %501 = vmatprep.subr.mxu0 %v461_v51  ;;  %620 = vmatprep.subr.mxu1 %v332_v50 }
 0x15a   :  { %502 = vmatpush1.msra.mxu0 %v459_v49  ;;  %621 = vmatpush1.msra.mxu1 %v330_v48 }
 0x15b   :  { %503 = vmatprep.subr.mxu0 %v455_v47  ;;  %622 = vmatprep.subr.mxu1 %v326_v46 }
 0x15c   :  { %504 = vmatpush1.msra.mxu0 %v453_v45  ;;  %623 = vmatpush1.msra.mxu1 %v324_v44 }
 0x15d   :  { %505 = vmatprep.subr.mxu0 %v449_v43  ;;  %624 = vmatprep.subr.mxu1 %v320_v42 }
 0x15e   :  { %506 = vmatpush1.msra.mxu0 %v447_v41  ;;  %625 = vmatpush1.msra.mxu1 %v318_v40 }
 0x15f   :  { %507 = vmatprep.subr.mxu0 %v443_v39  ;;  %626 = vmatprep.subr.mxu1 %v314_v38 }
 0x160   :  { %508 = vmatpush1.msra.mxu0 %v441_v37  ;;  %627 = vmatpush1.msra.mxu1 %v312_v36 }
 0x161   :  { %509 = vmatprep.subr.mxu0 %v437_v35  ;;  %628 = vmatprep.subr.mxu1 %v308_v34 }
 0x162   :  { %510 = vmatpush1.msra.mxu0 %v435_v33  ;;  %629 = vmatpush1.msra.mxu1 %v306_v32 }
 0x163   :  { %511 = vmatprep.subr.mxu0 %v431_v31  ;;  %630 = vmatprep.subr.mxu1 %v302_v30 }
 0x164   :  { %512 = vmatpush1.msra.mxu0 %v429_v29  ;;  %631 = vmatpush1.msra.mxu1 %v300_v28 }
 0x165   :  { %513 = vmatprep.subr.mxu0 %v425_v27  ;;  %632 = vmatprep.subr.mxu1 %v296_v26 }
 0x166   :  { %514 = vmatpush1.msra.mxu0 %v423_v25  ;;  %633 = vmatpush1.msra.mxu1 %v294_v24 }
 0x167   :  { %4048 = vmatmul.mubr.msk.f32.vlgmr.msra.gmra.mxu0 %vm464_vm2, %v336_v52  ;;  %4054 = vmatmul.mubr.msk.f32.vlgmr.msra.gmra.mxu1 %vm464_vm2, %v185_v53 }
 0x168   :  { %553 = vmatprep.mubr.f32.mxu0 %v5099_v0  ;;  %672 = vmatprep.mubr.f32.mxu1 %v5099_v0 }
 0x169   :  { %4060 = vmatprep.subr.msk.mxu0 %vm221_vm0, %v718_v54 }
 0x16a   :  { %4061 = vmatpush1.msk.msra.mxu0 %vm221_vm0, %v717_v55 }
 0x16b   :  { %4049 = vmatmul.mubr.msk.f32.gmra.mxu0 %vm464_vm2, %v337_v56  ;;  %4055 = vmatmul.mubr.msk.f32.gmra.mxu1 %vm464_vm2, %v186_v57 }
 0x16c   :  { %559 = vmatprep.mubr.f32.mxu0 %v5099_v0  ;;  %678 = vmatprep.mubr.f32.mxu1 %v5099_v0 }
 0x16d   :  { %751 = vmatprep.subr.mxu0 %v716_v58 }
 0x16e   :  { %752 = vmatpush1.msra.mxu0 %v715_v59 }
 0x16f   :  { %4050 = vmatmul.mubr.msk.f32.gmra.mxu0 %vm464_vm2, %v338_v60  ;;  %4056 = vmatmul.mubr.msk.f32.gmra.mxu1 %vm464_vm2, %v187_v61 }
 0x170   :  { %565 = vmatprep.mubr.f32.mxu0 %v5099_v0  ;;  %684 = vmatprep.mubr.f32.mxu1 %v5099_v0 }
 0x171   :  { %753 = vmatprep.subr.mxu0 %v714_v62 }
 0x172   :  { %754 = vmatpush1.msra.mxu0 %v713_v63 }
 0x173   :  { %4051 = vmatmul.mubr.msk.f32.gmra.mxu0 %vm464_vm2, %v339_v1  ;;  %4057 = vmatmul.mubr.msk.f32.gmra.mxu1 %vm464_vm2, %v188_v2  ;;  %v704_v1 = vld [vmem:[#allocation7 + $0x60] sm:$0xff]  ;;  %v978_v2 = vld [vmem:[#allocation5 + $0xf8] sm:$0xf] }
 0x174   :  { %571 = vmatprep.mubr.f32.mxu0 %v5099_v0  ;;  %690 = vmatprep.mubr.f32.mxu1 %v5099_v0 }
 0x175   :  { %755 = vmatprep.subr.mxu0 %v712_v3  ;;  %v977_v3 = vld [vmem:[#allocation5 + $0xf0] sm:$0xf] }
 0x176   :  { %756 = vmatpush1.msra.mxu0 %v711_v4  ;;  %v976_v4 = vld [vmem:[#allocation5 + $0xe8] sm:$0xff] }
 0x177   :  { %4052 = vmatmul.mubr.msk.f32.gmra.mxu0 %vm464_vm2, %v340_v5  ;;  %4058 = vmatmul.mubr.msk.f32.gmra.mxu1 %vm464_vm2, %v189_v6  ;;  %v975_v5 = vld [vmem:[#allocation5 + $0xe0] sm:$0xff]  ;;  %v705_v6 = vld [vmem:[#allocation7 + $0x68] sm:$0xff] }
 0x178   :  { %577 = vmatprep.mubr.f32.mxu0 %v5099_v0  ;;  %696 = vmatprep.mubr.f32.mxu1 %v5099_v0 }
 0x17b   :  { %4053 = vmatmul.mubr.msk.f32.gmra.mxu0 %vm464_vm2, %v341_v7  ;;  %4059 = vmatmul.mubr.msk.f32.gmra.mxu1 %vm464_vm2, %v190_v8  ;;  %v974_v7 = vld [vmem:[#allocation5 + $0xd8] sm:$0xff]  ;;  %v973_v8 = vld [vmem:[#allocation5 + $0xd0] sm:$0xff] }
 0x17c   :  { %789 = vmatprep.mubr.f32.mxu0 %v5099_v0  ;;  %914 = vmatprep.mubr.f32.mxu1 %v5099_v0 }
 0x17f   :  { %4062 = vmatmul.mubr.msk.f32.vlgmr.msra.gmra.mxu0 %vm199_vm1, %v5248_v17 }
 0x180   :  { %795 = vmatprep.mubr.f32.mxu0 %v5099_v0 }
 0x183   :  { %4063 = vmatmul.mubr.msk.f32.gmra.mxu0 %vm199_vm1, %v5256_v18 }
 0x184   :  { %801 = vmatprep.mubr.f32.mxu0 %v5099_v0 }
 0x187   :  { %4064 = vmatmul.mubr.msk.f32.gmra.mxu0 %vm199_vm1, %v5264_v19 }
 0x188   :  { %807 = vmatprep.mubr.f32.mxu0 %v5099_v0 }
 0x18b   :  { %4065 = vmatmul.mubr.msk.f32.gmra.mxu0 %vm199_vm1, %v5272_v20 }
 0x18c   :  { %813 = vmatprep.mubr.f32.mxu0 %v5099_v0 }
 0x18f   :  { %4066 = vmatmul.mubr.msk.f32.gmra.mxu0 %vm199_vm1, %v5280_v21 }
 0x190   :  { %819 = vmatprep.mubr.f32.mxu0 %v5099_v0 }
 0x193   :  { %4067 = vmatmul.mubr.msk.f32.gmra.mxu0 %vm199_vm1, %v5288_v22 }
 0x194   :  { %825 = vmatprep.mubr.f32.mxu0 %v5099_v0 }
 0x197   :  { %4068 = vmatmul.mubr.msk.f32.gmra.mxu0 %vm199_vm1, %v5296_v23 }
 0x198   :  { %1174 = vmatprep.mubr.f32.mxu0 %v5099_v0 }
 0x227   :  { %v549_v9 = vpop.f32.mrf.mxu0  ;;  %v668_v10 = vpop.f32.mrf.mxu1 }
 0x228   :  { %v5351_v11 = vadd.f32 %v668_v10, %v549_v9  ;;  %v972_v9 = vld [vmem:[#allocation5 + $0xc8] sm:$0xff]  ;;  %v971_v10 = vld [vmem:[#allocation5 + $0xc0] sm:$0xff] }
 0x229   :  { %v551_v12 = vpop.f32.mrf.mxu0  ;;  %v670_v13 = vpop.f32.mrf.mxu1 }
 0x22a   :  { %v5353_v14 = vadd.f32 %v670_v13, %v551_v12  ;;  %v706_v12 = vld [vmem:[#allocation7 + $0x70] sm:$0xff]  ;;  %v707_v13 = vld [vmem:[#allocation7 + $0x78] sm:$0xff] }
 0x22b   :  { %v555_v15 = vpop.f32.mrf.mxu0  ;;  %v674_v16 = vpop.f32.mrf.mxu1 }
 0x22c   :  { %v5355_v24 = vadd.f32 %v674_v16, %v555_v15  ;;  %v708_v15 = vld [vmem:[#allocation7 + $0x80] sm:$0xff]  ;;  %v709_v16 = vld [vmem:[#allocation7 + $0x88] sm:$0xff] }
 0x22d   :  { %v557_v25 = vpop.f32.mrf.mxu0  ;;  %v676_v26 = vpop.f32.mrf.mxu1 }
 0x22e   :  { %v5357_v27 = vadd.f32 %v676_v26, %v557_v25 }
 0x22f   :  { %v561_v28 = vpop.f32.mrf.mxu0  ;;  %v680_v29 = vpop.f32.mrf.mxu1 }
 0x230   :  { %v5359_v30 = vadd.f32 %v680_v29, %v561_v28 }
 0x231   :  { %v563_v31 = vpop.f32.mrf.mxu0  ;;  %v682_v32 = vpop.f32.mrf.mxu1 }
 0x232   :  { %v5361_v33 = vadd.f32 %v682_v32, %v563_v31 }
 0x233   :  { %v567_v34 = vpop.f32.mrf.mxu0  ;;  %v686_v35 = vpop.f32.mrf.mxu1 }
 0x234   :  { %v5363_v36 = vadd.f32 %v686_v35, %v567_v34 }
 0x235   :  { %v569_v37 = vpop.f32.mrf.mxu0  ;;  %v688_v38 = vpop.f32.mrf.mxu1 }
 0x236   :  { %v5365_v39 = vadd.f32 %v688_v38, %v569_v37 }
 0x237   :  { %v573_v40 = vpop.f32.mrf.mxu0  ;;  %v692_v41 = vpop.f32.mrf.mxu1 }
 0x238   :  { %v5367_v42 = vadd.f32 %v692_v41, %v573_v40 }
 0x239   :  { %v575_v43 = vpop.f32.mrf.mxu0  ;;  %v694_v44 = vpop.f32.mrf.mxu1 }
 0x23a   :  { %v5369_v45 = vadd.f32 %v694_v44, %v575_v43 }
 0x23b   :  { %v579_v46 = vpop.f32.mrf.mxu0  ;;  %v698_v47 = vpop.f32.mrf.mxu1 }
 0x23c   :  { %v5371_v48 = vadd.f32 %v698_v47, %v579_v46 }
 0x23d   :  { %v5373_v49 = vpop.f32.mrf.mxu0  ;;  %v700_v25 = vpop.f32.mrf.mxu1 }
 0x23f   :  { %v791_v50 = vpop.f32.mrf.mxu0 }
 0x241   :  { %v793_v51 = vpop.f32.mrf.mxu0 }
 0x243   :  { %v797_v52 = vpop.f32.mrf.mxu0 }
 0x245   :  { %v799_v53 = vpop.f32.mrf.mxu0 }
 0x247   :  { %v803_v54 = vpop.f32.mrf.mxu0 }
 0x249   :  { %v805_v55 = vpop.f32.mrf.mxu0 }
 0x24b   :  { %v809_v56 = vpop.f32.mrf.mxu0 }
 0x24d   :  { %v811_v57 = vpop.f32.mrf.mxu0 }
 0x24f   :  { %v815_v58 = vpop.f32.mrf.mxu0 }
 0x251   :  { %v817_v59 = vpop.f32.mrf.mxu0 }
 0x253   :  { %v821_v60 = vpop.f32.mrf.mxu0 }
 0x255   :  { %v823_v61 = vpop.f32.mrf.mxu0 }
 0x257   :  { %v827_v62 = vpop.f32.mrf.mxu0 }
 0x259   :  { %v829_v63 = vpop.f32.mrf.mxu0 }
 0x25a   :  { %868 = vmatprep.subr.mxu1 %v829_v63  ;;  %v1238_v63 = vld [vmem:[#allocation5 + $0x138] sm:$0xf] }
 0x25b   :  { %869 = vmatpush1.msra.mxu1 %v827_v62 }
 0x25c   :  { %870 = vmatprep.subr.mxu1 %v823_v61 }
 0x25d   :  { %871 = vmatpush1.msra.mxu1 %v821_v60 }
 0x25e   :  { %872 = vmatprep.subr.mxu1 %v817_v59 }
 0x25f   :  { %873 = vmatpush1.msra.mxu1 %v815_v58 }
 0x260   :  { %874 = vmatprep.subr.mxu1 %v811_v57 }
 0x261   :  { %875 = vmatpush1.msra.mxu1 %v809_v56 }
 0x262   :  { %876 = vmatprep.subr.mxu1 %v805_v55 }
 0x263   :  { %877 = vmatpush1.msra.mxu1 %v803_v54 }
 0x264   :  { %878 = vmatprep.subr.mxu1 %v799_v53 }
 0x265   :  { %879 = vmatpush1.msra.mxu1 %v797_v52 }
 0x266   :  { %880 = vmatprep.subr.mxu1 %v793_v51 }
 0x267   :  { %881 = vmatpush1.msra.mxu1 %v791_v50 }
 0x268   :  { %4069 = vmatmul.mubr.msk.f32.vlgmr.msra.gmra.mxu1 %vm464_vm2, %v704_v1  ;;  %4075 = vmatprep.subr.msk.mxu1 %vm221_vm0, %v978_v2  ;;  %v1237_v1 = vld [vmem:[#allocation5 + $0x130] sm:$0xf]  ;;  %v1236_v2 = vld [vmem:[#allocation5 + $0x128] sm:$0xff] }
 0x269   :  { %920 = vmatprep.mubr.f32.mxu1 %v5099_v0  ;;  %4076 = vmatpush1.msk.msra.mxu1 %vm221_vm0, %v977_v3  ;;  %v1235_v3 = vld [vmem:[#allocation5 + $0x120] sm:$0xff] }
 0x26a   :  { %1011 = vmatprep.subr.mxu1 %v976_v4  ;;  %v965_v4 = vld [vmem:[#allocation7 + $0x98] sm:$0xff] }
 0x26b   :  { %1012 = vmatpush1.msra.mxu1 %v975_v5  ;;  %v1234_v5 = vld [vmem:[#allocation5 + $0x118] sm:$0xff] }
 0x26c   :  { %4070 = vmatmul.mubr.msk.f32.gmra.mxu1 %vm464_vm2, %v705_v6  ;;  %1013 = vmatprep.subr.mxu1 %v974_v7  ;;  %v1233_v6 = vld [vmem:[#allocation5 + $0x110] sm:$0xff]  ;;  %v1232_v7 = vld [vmem:[#allocation5 + $0x108] sm:$0xff] }
 0x26d   :  { %926 = vmatprep.mubr.f32.mxu1 %v5099_v0  ;;  %1014 = vmatpush1.msra.mxu1 %v973_v8  ;;  %v1231_v8 = vld [vmem:[#allocation5 + $0x100] sm:$0xff] }
 0x26e   :  { %1015 = vmatprep.subr.mxu1 %v972_v9  ;;  %v966_v9 = vld [vmem:[#allocation7 + $0xa0] sm:$0xff] }
 0x26f   :  { %1016 = vmatpush1.msra.mxu1 %v971_v10  ;;  %v967_v10 = vld [vmem:[#allocation7 + $0xa8] sm:$0xff] }
 0x270   :  { %4071 = vmatmul.mubr.msk.f32.gmra.mxu1 %vm464_vm2, %v706_v12  ;;  %v968_v12 = vld [vmem:[#allocation7 + $0xb0] sm:$0xff] }
 0x271   :  { %932 = vmatprep.mubr.f32.mxu1 %v5099_v0 }
 0x274   :  { %4072 = vmatmul.mubr.msk.f32.gmra.mxu1 %vm464_vm2, %v707_v13  ;;  %v969_v13 = vld [vmem:[#allocation7 + $0xb8] sm:$0xff] }
 0x275   :  { %938 = vmatprep.mubr.f32.mxu1 %v5099_v0 }
 0x278   :  { %4073 = vmatmul.mubr.msk.f32.gmra.mxu1 %vm464_vm2, %v708_v15  ;;  %v1527_v15 = vld [vmem:[#allocation8 + $0x40] sm:$0xff] }
 0x279   :  { %944 = vmatprep.mubr.f32.mxu1 %v5099_v0 }
 0x27c   :  { %4074 = vmatmul.mubr.msk.f32.gmra.mxu1 %vm464_vm2, %v709_v16  ;;  %v1526_v16 = vld [vmem:[#allocation8 + $0x38] sm:$0xff] }
 0x27d   :  { %1049 = vmatprep.mubr.f32.mxu1 %v5099_v0 }
 0x280   :  { %4077 = vmatmul.mubr.msk.f32.vlgmr.msra.gmra.mxu1 %vm199_vm1, %v5248_v17 }
 0x281   :  { %1055 = vmatprep.mubr.f32.mxu1 %v5099_v0 }
 0x284   :  { %4078 = vmatmul.mubr.msk.f32.gmra.mxu1 %vm199_vm1, %v5256_v18 }
 0x285   :  { %1061 = vmatprep.mubr.f32.mxu1 %v5099_v0 }
 0x288   :  { %4079 = vmatmul.mubr.msk.f32.gmra.mxu1 %vm199_vm1, %v5264_v19 }
 0x289   :  { %1067 = vmatprep.mubr.f32.mxu1 %v5099_v0 }
 0x28c   :  { %4080 = vmatmul.mubr.msk.f32.gmra.mxu1 %vm199_vm1, %v5272_v20 }
 0x28d   :  { %1073 = vmatprep.mubr.f32.mxu1 %v5099_v0 }
 0x290   :  { %4081 = vmatmul.mubr.msk.f32.gmra.mxu1 %vm199_vm1, %v5280_v21 }
 0x291   :  { %1079 = vmatprep.mubr.f32.mxu1 %v5099_v0 }
 0x294   :  { %4082 = vmatmul.mubr.msk.f32.gmra.mxu1 %vm199_vm1, %v5288_v22 }
 0x295   :  { %1085 = vmatprep.mubr.f32.mxu1 %v5099_v0 }
 0x298   :  { %4083 = vmatmul.mubr.msk.f32.gmra.mxu1 %vm199_vm1, %v5296_v23 }
 0x299   :  { %1434 = vmatprep.mubr.f32.mxu1 %v5099_v0 }
 0x328   :  { %v916_v26 = vpop.f32.mrf.mxu1 }
 0x329   :  { %v5411_v28 = vadd.f32 %v916_v26, %v5351_v11  ;;  %v1524_v26 = vld [vmem:[#allocation8 + $0x28] sm:$0xff] }
 0x32a   :  { %v918_v29 = vpop.f32.mrf.mxu1 }
 0x32b   :  { %v5414_v31 = vadd.f32 %v918_v29, %v5353_v14  ;;  %v1523_v29 = vld [vmem:[#allocation8 + $0x20] sm:$0xff] }
 0x32c   :  { %v922_v32 = vpop.f32.mrf.mxu1 }
 0x32d   :  { %v5417_v34 = vadd.f32 %v922_v32, %v5355_v24  ;;  %v1522_v32 = vld [vmem:[#allocation8 + $0x18] sm:$0xff] }
 0x32e   :  { %v924_v35 = vpop.f32.mrf.mxu1 }
 0x32f   :  { %v5420_v37 = vadd.f32 %v924_v35, %v5357_v27 }
 0x330   :  { %v928_v38 = vpop.f32.mrf.mxu1 }
 0x331   :  { %v5423_v40 = vadd.f32 %v928_v38, %v5359_v30 }
 0x332   :  { %v930_v41 = vpop.f32.mrf.mxu1 }
 0x333   :  { %v5426_v11 = vadd.f32 %v930_v41, %v5361_v33  ;;  %v701_v33 = vadd.f32 %v700_v25, %v5373_v49  ;;  %v1525_v25 = vld [vmem:[#allocation8 + $0x30] sm:$0xff] }
 0x334   :  { %v934_v43 = vpop.f32.mrf.mxu1 }
 0x335   :  { %v5429_v14 = vadd.f32 %v934_v43, %v5363_v36 }
 0x336   :  { %v936_v44 = vpop.f32.mrf.mxu1 }
 0x337   :  { %v5432_v24 = vadd.f32 %v936_v44, %v5365_v39 }
 0x338   :  { %v940_v46 = vpop.f32.mrf.mxu1 }
 0x339   :  { %v5435_v27 = vadd.f32 %v940_v46, %v5367_v42 }
 0x33a   :  { %v942_v47 = vpop.f32.mrf.mxu1 }
 0x33b   :  { %v5438_v30 = vadd.f32 %v942_v47, %v5369_v45 }
 0x33c   :  { %v946_v50 = vpop.f32.mrf.mxu1 }
 0x33d   :  { %v5442_v51 = vadd.f32 %v946_v50, %v5371_v48  ;;  %v964_v48 = vld [vmem:[#allocation7 + $0x90] sm:$0xff] }
 0x33e   :  { %v948_v36 = vpop.f32.mrf.mxu1 }
 0x33f   :  { %v5444_v52 = vadd.f32 %v948_v36, %v701_v33 }
 0x340   :  { %v1051_v53 = vpop.f32.mrf.mxu1 }
 0x342   :  { %v1053_v39 = vpop.f32.mrf.mxu1 }
 0x344   :  { %v1057_v54 = vpop.f32.mrf.mxu1 }
 0x346   :  { %v1059_v55 = vpop.f32.mrf.mxu1 }
 0x348   :  { %v1063_v56 = vpop.f32.mrf.mxu1 }
 0x34a   :  { %v1065_v42 = vpop.f32.mrf.mxu1 }
 0x34c   :  { %v1069_v57 = vpop.f32.mrf.mxu1 }
 0x34e   :  { %v1071_v58 = vpop.f32.mrf.mxu1 }
 0x350   :  { %v1075_v59 = vpop.f32.mrf.mxu1 }
 0x352   :  { %v1077_v45 = vpop.f32.mrf.mxu1 }
 0x354   :  { %v1081_v60 = vpop.f32.mrf.mxu1 }
 0x356   :  { %v1083_v61 = vpop.f32.mrf.mxu1 }
 0x358   :  { %v1087_v62 = vpop.f32.mrf.mxu1 }
 0x35a   :  { %v1089_v49 = vpop.f32.mrf.mxu1 }
 0x35b   :  { %1128 = vmatprep.subr.mxu0 %v1089_v49 }
 0x35c   :  { %1129 = vmatpush1.msra.mxu0 %v1087_v62 }
 0x35d   :  { %1130 = vmatprep.subr.mxu0 %v1083_v61 }
 0x35e   :  { %1131 = vmatpush1.msra.mxu0 %v1081_v60 }
 0x35f   :  { %1132 = vmatprep.subr.mxu0 %v1077_v45 }
 0x360   :  { %1133 = vmatpush1.msra.mxu0 %v1075_v59 }
 0x361   :  { %1134 = vmatprep.subr.mxu0 %v1071_v58 }
 0x362   :  { %1135 = vmatpush1.msra.mxu0 %v1069_v57 }
 0x363   :  { %1136 = vmatprep.subr.mxu0 %v1065_v42 }
 0x364   :  { %1137 = vmatpush1.msra.mxu0 %v1063_v56 }
 0x365   :  { %1138 = vmatprep.subr.mxu0 %v1059_v55 }
 0x366   :  { %1139 = vmatpush1.msra.mxu0 %v1057_v54 }
 0x367   :  { %1140 = vmatprep.subr.mxu0 %v1053_v39 }
 0x368   :  { %1141 = vmatpush1.msra.mxu0 %v1051_v53 }
 0x369   :  { %4084 = vmatmul.mubr.msk.f32.vlgmr.msra.gmra.mxu0 %vm464_vm2, %v964_v48  ;;  %4090 = vmatprep.subr.msk.mxu0 %vm221_vm0, %v1238_v63 }
 0x36a   :  { %1180 = vmatprep.mubr.f32.mxu0 %v5099_v0  ;;  %4091 = vmatpush1.msk.msra.mxu0 %vm221_vm0, %v1237_v1 }
 0x36b   :  { %1271 = vmatprep.subr.mxu0 %v1236_v2 }
 0x36c   :  { %1272 = vmatpush1.msra.mxu0 %v1235_v3  ;;  %v1666_v3 = vld [vmem:[#allocation8 + $0x100] sm:$0xff] }
 0x36d   :  { %4085 = vmatmul.mubr.msk.f32.gmra.mxu0 %vm464_vm2, %v965_v4  ;;  %1273 = vmatprep.subr.mxu0 %v1234_v5  ;;  %v1225_v4 = vld [vmem:[#allocation7 + $0xc8] sm:$0xff] }
 0x36e   :  { %1186 = vmatprep.mubr.f32.mxu0 %v5099_v0  ;;  %1274 = vmatpush1.msra.mxu0 %v1233_v6  ;;  %v1665_v5 = vld [vmem:[#allocation8 + $0xf8] sm:$0xff]  ;;  %v1664_v6 = vld [vmem:[#allocation8 + $0xf0] sm:$0xff] }
 0x36f   :  { %1275 = vmatprep.subr.mxu0 %v1232_v7  ;;  %v1226_v7 = vld [vmem:[#allocation7 + $0xd0] sm:$0xff] }
 0x370   :  { %1276 = vmatpush1.msra.mxu0 %v1231_v8  ;;  %v1663_v8 = vld [vmem:[#allocation8 + $0xe8] sm:$0xff] }
 0x371   :  { %4086 = vmatmul.mubr.msk.f32.gmra.mxu0 %vm464_vm2, %v966_v9  ;;  %1556 = vmatprep.subr.mxu0 %v5099_v0  ;;  %v1662_v9 = vld [vmem:[#allocation8 + $0xe0] sm:$0xff] }
 0x372   :  { %1192 = vmatprep.mubr.f32.mxu0 %v5099_v0 }
 0x375   :  { %4087 = vmatmul.mubr.msk.f32.gmra.mxu0 %vm464_vm2, %v967_v10  ;;  %v1227_v10 = vld [vmem:[#allocation7 + $0xd8] sm:$0xff] }
 0x376   :  { %1198 = vmatprep.mubr.f32.mxu0 %v5099_v0 }
 0x379   :  { %4088 = vmatmul.mubr.msk.f32.gmra.mxu0 %vm464_vm2, %v968_v12  ;;  %v1661_v12 = vld [vmem:[#allocation8 + $0xd8] sm:$0xff] }
 0x37a   :  { %1204 = vmatprep.mubr.f32.mxu0 %v5099_v0 }
 0x37d   :  { %4089 = vmatmul.mubr.msk.f32.gmra.mxu0 %vm464_vm2, %v969_v13  ;;  %v1660_v13 = vld [vmem:[#allocation8 + $0xd0] sm:$0xff] }
 0x37e   :  { %1309 = vmatprep.mubr.f32.mxu0 %v5099_v0 }
 0x381   :  { %4092 = vmatmul.mubr.msk.f32.vlgmr.msra.gmra.mxu0 %vm199_vm1, %v5248_v17  ;;  %v1534_v17 = vld [vmem:[#allocation8 + $0x78] sm:$0xff] }
 0x382   :  { %1315 = vmatprep.mubr.f32.mxu0 %v5099_v0  ;;  %1557 = vmatpush1.msra.mxu0 %v1534_v17  ;;  %v1228_v17 = vld [vmem:[#allocation7 + $0xe0] sm:$0xff] }
 0x383   :  { %1558 = vmatprep.subr.mxu0 %v5099_v0 }
 0x385   :  { %4093 = vmatmul.mubr.msk.f32.gmra.mxu0 %vm199_vm1, %v5256_v18  ;;  %v1533_v18 = vld [vmem:[#allocation8 + $0x70] sm:$0xff] }
 0x386   :  { %1321 = vmatprep.mubr.f32.mxu0 %v5099_v0  ;;  %1559 = vmatpush1.msra.mxu0 %v1533_v18  ;;  %v1659_v18 = vld [vmem:[#allocation8 + $0xc8] sm:$0xff] }
 0x387   :  { %1560 = vmatprep.subr.mxu0 %v5099_v0 }
 0x389   :  { %4094 = vmatmul.mubr.msk.f32.gmra.mxu0 %vm199_vm1, %v5264_v19  ;;  %v1532_v19 = vld [vmem:[#allocation8 + $0x68] sm:$0xff] }
 0x38a   :  { %1327 = vmatprep.mubr.f32.mxu0 %v5099_v0  ;;  %1561 = vmatpush1.msra.mxu0 %v1532_v19  ;;  %v1658_v19 = vld [vmem:[#allocation8 + $0xc0] sm:$0xff] }
 0x38b   :  { %1562 = vmatprep.subr.mxu0 %v5099_v0 }
 0x38d   :  { %4095 = vmatmul.mubr.msk.f32.gmra.mxu0 %vm199_vm1, %v5272_v20  ;;  %v1531_v20 = vld [vmem:[#allocation8 + $0x60] sm:$0xff] }
 0x38e   :  { %1333 = vmatprep.mubr.f32.mxu0 %v5099_v0  ;;  %1563 = vmatpush1.msra.mxu0 %v1531_v20  ;;  %v1229_v20 = vld [vmem:[#allocation7 + $0xe8] sm:$0xff] }
 0x38f   :  { %1564 = vmatprep.subr.mxu0 %v5099_v0 }
 0x391   :  { %4096 = vmatmul.mubr.msk.f32.gmra.mxu0 %vm199_vm1, %v5280_v21  ;;  %v1530_v21 = vld [vmem:[#allocation8 + $0x58] sm:$0xff] }
 0x392   :  { %1339 = vmatprep.mubr.f32.mxu0 %v5099_v0  ;;  %1565 = vmatpush1.msra.mxu0 %v1530_v21  ;;  %v1657_v21 = vld [vmem:[#allocation8 + $0xb8] sm:$0xff] }
 0x393   :  { %1566 = vmatprep.subr.mxu0 %v5099_v0 }
 0x395   :  { %4097 = vmatmul.mubr.msk.f32.gmra.mxu0 %vm199_vm1, %v5288_v22  ;;  %v1529_v22 = vld [vmem:[#allocation8 + $0x50] sm:$0xff] }
 0x396   :  { %1345 = vmatprep.mubr.f32.mxu0 %v5099_v0  ;;  %1567 = vmatpush1.msra.mxu0 %v1529_v22  ;;  %v1656_v22 = vld [vmem:[#allocation8 + $0xb0] sm:$0xff] }
 0x397   :  { %1568 = vmatprep.subr.mxu0 %v5099_v0 }
 0x399   :  { %4098 = vmatmul.mubr.msk.f32.gmra.mxu0 %vm199_vm1, %v5296_v23  ;;  %v1528_v23 = vld [vmem:[#allocation8 + $0x48] sm:$0xff] }
 0x39a   :  { %1569 = vmatpush1.msra.mxu0 %v1528_v23  ;;  %v1655_v23 = vld [vmem:[#allocation8 + $0xa8] sm:$0xff] }
 0x39b   :  { %1570 = vmatprep.subr.mxu0 %v5099_v0 }
 0x39c   :  { %1571 = vmatpush1.msra.mxu0 %v1527_v15  ;;  %v1521_v15 = vld [vmem:[#allocation8 + $0x10] sm:$0xff] }
 0x39d   :  { %1572 = vmatprep.subr.mxu0 %v5099_v0 }
 0x39e   :  { %1573 = vmatpush1.msra.mxu0 %v1526_v16  ;;  %v1654_v16 = vld [vmem:[#allocation8 + $0xa0] sm:$0xff] }
 0x39f   :  { %1574 = vmatprep.subr.mxu0 %v5099_v0 }
 0x3a0   :  { %1575 = vmatpush1.msra.mxu0 %v1525_v25  ;;  %v1520_v25 = vld [vmem:[#allocation8 + $0x8] sm:$0xff] }
 0x3a1   :  { %1576 = vmatprep.subr.mxu0 %v5099_v0 }
 0x3a2   :  { %1577 = vmatpush1.msra.mxu0 %v1524_v26  ;;  %v1653_v26 = vld [vmem:[#allocation8 + $0x98] sm:$0xff] }
 0x3a3   :  { %1578 = vmatprep.subr.mxu0 %v5099_v0 }
 0x3a4   :  { %1579 = vmatpush1.msra.mxu0 %v1523_v29  ;;  %v1519_v29 = vld [vmem:[#allocation8] sm:$0xff] }
 0x3a5   :  { %1580 = vmatprep.subr.mxu0 %v5099_v0 }
 0x3a6   :  { %1581 = vmatpush1.msra.mxu0 %v1522_v32  ;;  %v1652_v32 = vld [vmem:[#allocation8 + $0x90] sm:$0xff] }
 0x3a7   :  { %1582 = vmatprep.subr.mxu0 %v5099_v0 }
 0x3a8   :  { %1583 = vmatpush1.msra.mxu0 %v1521_v15 }
 0x3a9   :  { %1584 = vmatprep.subr.mxu0 %v5099_v0 }
 0x3aa   :  { %1585 = vmatpush1.msra.mxu0 %v1520_v25 }
 0x3ab   :  { %1586 = vmatprep.subr.mxu0 %v5099_v0 }
 0x3ac   :  { %1587 = vmatpush1.msra.mxu0 %v1519_v29 }
 0x3ad   :  { %1616 = vmatprep.subr.mxu0 %v5099_v0 }
 0x429   :  { %v1176_v35 = vpop.f32.mrf.mxu0 }
 0x42a   :  { %v5495_v38 = vadd.f32 %v1176_v35, %v5411_v28  ;;  %v1536_v35 = vld [vmem:[#allocation8 + $0x88] sm:$0xff] }
 0x42b   :  { %v1178_v41 = vpop.f32.mrf.mxu0  ;;  %1617 = vmatpush2.msra.mxu0 %v1536_v35 }
 0x42c   :  { %v5498_v43 = vadd.f32 %v1178_v41, %v5414_v31  ;;  %v1669_v41 = vld [vmem:[#allocation8 + $0x118] sm:$0xff]  ;;  %1618 = vmatprep.subr.mxu0 %v5099_v0 }
 0x42d   :  { %v1182_v44 = vpop.f32.mrf.mxu0 }
 0x42e   :  { %v5501_v46 = vadd.f32 %v1182_v44, %v5417_v34  ;;  %v1535_v44 = vld [vmem:[#allocation8 + $0x80] sm:$0xff] }
 0x42f   :  { %v1184_v47 = vpop.f32.mrf.mxu0  ;;  %1619 = vmatpush2.msra.mxu0 %v1535_v44 }
 0x430   :  { %v5504_v50 = vadd.f32 %v1184_v47, %v5420_v37  ;;  %v1668_v47 = vld [vmem:[#allocation8 + $0x110] sm:$0xff]  ;;  %4436 = vmatprep.subr.mxu0 %v5099_v0 }
 0x431   :  { %v1188_v33 = vpop.f32.mrf.mxu0 }
 0x432   :  { %v5507_v36 = vadd.f32 %v1188_v33, %v5423_v40  ;;  %v1485_v33 = vlaneseq }
 0x433   :  { %v1190_v53 = vpop.f32.mrf.mxu0 }
 0x434   :  { %v5510_v28 = vadd.f32 %v1190_v53, %v5426_v11  ;;  %v1486_v53 = vshrl.u32 %v1485_v33, 7 }
 0x435   :  { %v1194_v39 = vpop.f32.mrf.mxu0 }
 0x436   :  { %v5513_v31 = vadd.f32 %v1194_v39, %v5429_v14  ;;  %v1487_v39 = vsub.s32 0, %v1486_v53 }
 0x437   :  { %v1196_v54 = vpop.f32.mrf.mxu0 }
 0x438   :  { %v5516_v34 = vadd.f32 %v1196_v54, %v5432_v24  ;;  %v1483_v54 = vld [vmem:[%s6224_s3] sm:$0x3] }
 0x439   :  { %v1200_v55 = vpop.f32.mrf.mxu0 }
 0x43a   :  { %v5519_v37 = vadd.f32 %v1200_v55, %v5435_v27  ;;  %v1491_v55 = vsub.s32 1, %v1486_v53 }
 0x43b   :  { %v1202_v56 = vpop.f32.mrf.mxu0 }
 0x43c   :  { %v5522_v40 = vadd.f32 %v1202_v56, %v5438_v30 }
 0x43d   :  { %v1206_v42 = vpop.f32.mrf.mxu0 }
 0x43e   :  { %v5525_v11 = vadd.f32 %v1206_v42, %v5442_v51  ;;  %v1224_v51 = vld [vmem:[#allocation7 + $0xc0] sm:$0xff]  ;;  %v1488_v42 = vrot.slane %v1483_v54, %v1487_v39 }
 0x43f   :  { %v1208_v57 = vpop.f32.mrf.mxu0 }
 0x440   :  { %v5528_v14 = vadd.f32 %v1208_v57, %v5444_v52  ;;  %v1667_v52 = vld [vmem:[#allocation8 + $0x108] sm:$0xff] }
 0x441   :  { %v1311_v58 = vpop.f32.mrf.mxu0 }
 0x443   :  { %v1313_v59 = vpop.f32.mrf.mxu0 }
 0x445   :  { %v1317_v24 = vpop.f32.mrf.mxu0 }
 0x447   :  { %v1319_v45 = vpop.f32.mrf.mxu0 }
 0x449   :  { %v1323_v60 = vpop.f32.mrf.mxu0 }
 0x44b   :  { %v1325_v61 = vpop.f32.mrf.mxu0 }
 0x44d   :  { %v1329_v27 = vpop.f32.mrf.mxu0 }
 0x44f   :  { %v1331_v62 = vpop.f32.mrf.mxu0 }
 0x451   :  { %v1335_v49 = vpop.f32.mrf.mxu0 }
 0x453   :  { %v1337_v48 = vpop.f32.mrf.mxu0 }
 0x455   :  { %v1341_v30 = vpop.f32.mrf.mxu0 }
 0x457   :  { %v1343_v63 = vpop.f32.mrf.mxu0 }
 0x459   :  { %v1347_v1 = vpop.f32.mrf.mxu0 }
 0x45b   :  { %v1349_v2 = vpop.f32.mrf.mxu0 }
 0x45c   :  { %1388 = vmatprep.subr.mxu1 %v1349_v2 }
 0x45d   :  { %1389 = vmatpush1.msra.mxu1 %v1347_v1 }
 0x45e   :  { %1390 = vmatprep.subr.mxu1 %v1343_v63 }
 0x45f   :  { %1391 = vmatpush1.msra.mxu1 %v1341_v30 }
 0x460   :  { %1392 = vmatprep.subr.mxu1 %v1337_v48 }
 0x461   :  { %1393 = vmatpush1.msra.mxu1 %v1335_v49 }
 0x462   :  { %1394 = vmatprep.subr.mxu1 %v1331_v62 }
 0x463   :  { %1395 = vmatpush1.msra.mxu1 %v1329_v27 }
 0x464   :  { %1396 = vmatprep.subr.mxu1 %v1325_v61 }
 0x465   :  { %1397 = vmatpush1.msra.mxu1 %v1323_v60 }
 0x466   :  { %1398 = vmatprep.subr.mxu1 %v1319_v45 }
 0x467   :  { %1399 = vmatpush1.msra.mxu1 %v1317_v24 }
 0x468   :  { %1400 = vmatprep.subr.mxu1 %v1313_v59 }
 0x469   :  { %1401 = vmatpush1.msra.mxu1 %v1311_v58  ;;  %v1492_v58 = vrot.slane %v1483_v54, %v1491_v55 }
 0x46a   :  { %4099 = vmatmul.mubr.msk.f32.vlgmr.msra.gmra.mxu1 %vm464_vm2, %v1224_v51  ;;  %1670 = vmatprep.subr.mxu1 %v5099_v0 }
 0x46b   :  { %1440 = vmatprep.mubr.f32.mxu1 %v5099_v0  ;;  %1671 = vmatpush1.msra.mxu1 %v1667_v52 }
 0x46c   :  { %1672 = vmatprep.subr.mxu1 %v5099_v0 }
 0x46d   :  { %1673 = vmatpush1.msra.mxu1 %v1666_v3 }
 0x46e   :  { %4100 = vmatmul.mubr.msk.f32.gmra.mxu1 %vm464_vm2, %v1225_v4  ;;  %1674 = vmatprep.subr.mxu1 %v5099_v0 }
 0x46f   :  { %1446 = vmatprep.mubr.f32.mxu1 %v5099_v0  ;;  %1675 = vmatpush1.msra.mxu1 %v1665_v5 }
 0x470   :  { %1676 = vmatprep.subr.mxu1 %v5099_v0 }
 0x471   :  { %1677 = vmatpush1.msra.mxu1 %v1664_v6 }
 0x472   :  { %4101 = vmatmul.mubr.msk.f32.gmra.mxu1 %vm464_vm2, %v1226_v7  ;;  %1678 = vmatprep.subr.mxu1 %v5099_v0 }
 0x473   :  { %1452 = vmatprep.mubr.f32.mxu1 %v5099_v0  ;;  %1679 = vmatpush1.msra.mxu1 %v1663_v8 }
 0x474   :  { %1680 = vmatprep.subr.mxu1 %v5099_v0 }
 0x475   :  { %1681 = vmatpush1.msra.mxu1 %v1662_v9 }
 0x476   :  { %4102 = vmatmul.mubr.msk.f32.gmra.mxu1 %vm464_vm2, %v1227_v10  ;;  %1682 = vmatprep.subr.mxu1 %v5099_v0 }
 0x477   :  { %1458 = vmatprep.mubr.f32.mxu1 %v5099_v0  ;;  %1683 = vmatpush1.msra.mxu1 %v1661_v12 }
 0x478   :  { %1684 = vmatprep.subr.mxu1 %v5099_v0 }
 0x479   :  { %1685 = vmatpush1.msra.mxu1 %v1660_v13 }
 0x47a   :  { %4103 = vmatmul.mubr.msk.f32.gmra.mxu1 %vm464_vm2, %v1228_v17  ;;  %1686 = vmatprep.subr.mxu1 %v5099_v0 }
 0x47b   :  { %1464 = vmatprep.mubr.f32.mxu1 %v5099_v0  ;;  %1687 = vmatpush1.msra.mxu1 %v1659_v18 }
 0x47c   :  { %1688 = vmatprep.subr.mxu1 %v5099_v0 }
 0x47d   :  { %1689 = vmatpush1.msra.mxu1 %v1658_v19 }
 0x47e   :  { %4104 = vmatmul.mubr.msk.f32.gmra.mxu1 %vm464_vm2, %v1229_v20  ;;  %1690 = vmatprep.subr.mxu1 %v5099_v0 }
 0x47f   :  { %1691 = vmatpush1.msra.mxu1 %v1657_v21 }
 0x480   :  { %1692 = vmatprep.subr.mxu1 %v5099_v0 }
 0x481   :  { %1693 = vmatpush1.msra.mxu1 %v1656_v22 }
 0x482   :  { %1694 = vmatprep.subr.mxu1 %v5099_v0 }
 0x483   :  { %1695 = vmatpush1.msra.mxu1 %v1655_v23 }
 0x484   :  { %1696 = vmatprep.subr.mxu1 %v5099_v0 }
 0x485   :  { %1697 = vmatpush1.msra.mxu1 %v1654_v16 }
 0x486   :  { %1698 = vmatprep.subr.mxu1 %v5099_v0 }
 0x487   :  { %1699 = vmatpush1.msra.mxu1 %v1653_v26 }
 0x488   :  { %1700 = vmatprep.subr.mxu1 %v5099_v0 }
 0x489   :  { %1701 = vmatpush1.msra.mxu1 %v1652_v32 }
 0x48a   :  { %1730 = vmatprep.subr.mxu1 %v5099_v0 }
 0x48b   :  { %1731 = vmatpush2.msra.mxu1 %v1669_v41 }
 0x48c   :  { %1732 = vmatprep.subr.mxu1 %v5099_v0 }
 0x48d   :  { %1733 = vmatpush2.msra.mxu1 %v1668_v47 }
 0x48e   :  { %4457 = vmatprep.subr.mxu1 %v5099_v0 }
 0x52a   :  { %v1436_v56 = vpop.f32.mrf.mxu1 }
 0x52b   :  { %v1471_v57 = vadd.f32 %v1436_v56, %v5495_v38 }
 0x52c   :  { %v1438_v59 = vpop.f32.mrf.mxu1 }
 0x52d   :  { %v1472_v24 = vadd.f32 %v1438_v59, %v5498_v43  ;;  %v1495_v45 = vadd.f32 %v1488_v42, %v1471_v57 }
 0x52e   :  { %v1442_v60 = vpop.f32.mrf.mxu1 }
 0x52f   :  { %v1496_v61 = vadd.f32 %v1492_v58, %v1472_v24  ;;  %v1473_v27 = vadd.f32 %v1442_v60, %v5501_v46  ;;  %v1507_v30 = vmax.f32 %v1495_v45, 0.0 }
 0x530   :  { %v1444_v62 = vpop.f32.mrf.mxu1 }
 0x531   :  { %v1508_v49 = vmax.f32 %v1496_v61, 0.0  ;;  %v1474_v48 = vadd.f32 %v1444_v62, %v5504_v50  ;;  %v1497_v63 = vadd.f32 %v1488_v42, %v1473_v27 }
 0x532   :  { %v1448_v1 = vpop.f32.mrf.mxu1 }
 0x533   :  { %v1498_v2 = vadd.f32 %v1492_v58, %v1474_v48  ;;  %v1475_v38 = vadd.f32 %v1448_v1, %v5507_v36  ;;  %4105 = vmatprep.mubr.msk.f32.mxu0 %vm1537_vm3, %v1508_v49  ;;  %4111 = vmatprep.mubr.msk.f32.mxu1 %vm1537_vm3, %v1508_v49  ;;  %v1509_v52 = vmax.f32 %v1497_v63, 0.0 }
 0x534   :  { %v1450_v43 = vpop.f32.mrf.mxu1  ;;  %1621 = vmatmul.mubr.f32.vlgmr.msra.gmra.mxu0 %v1507_v30  ;;  %1735 = vmatmul.mubr.f32.vlgmr.msra.gmra.mxu1 %v1507_v30 }
 0x535   :  { %v1510_v51 = vmax.f32 %v1498_v2, 0.0  ;;  %v1476_v46 = vadd.f32 %v1450_v43, %v5510_v28  ;;  %v1499_v3 = vadd.f32 %v1488_v42, %v1475_v38  ;;  %v1771_v38 = vld [vmem:[#allocation10] sm:$0xff]  ;;  %v1865_v43 = vld [vmem:[#allocation10 + $0x18] sm:$0xff] }
 0x536   :  { %v1454_v4 = vpop.f32.mrf.mxu1 }
 0x537   :  { %v1500_v50 = vadd.f32 %v1492_v58, %v1476_v46  ;;  %v1477_v5 = vadd.f32 %v1454_v4, %v5513_v31  ;;  %4106 = vmatprep.mubr.msk.f32.mxu0 %vm1537_vm3, %v1510_v51  ;;  %4112 = vmatprep.mubr.msk.f32.mxu1 %vm1537_vm3, %v1510_v51  ;;  %v1511_v8 = vmax.f32 %v1499_v3, 0.0  ;;  %v1970_v51 = vld [vmem:[%s6227_s6 + $0x40] sm:$0xff]  ;;  %v4134_v46 = vld [vmem:[%s6227_s6 + $0x88] sm:$0xff]  ;;  %v1969_v4 = vld [vmem:[%s6227_s6 + $0x38] sm:$0xff] }
 0x538   :  { %v1456_v36 = vpop.f32.mrf.mxu1  ;;  %1626 = vmatmul.mubr.f32.gmra.mxu0 %v1509_v52  ;;  %1740 = vmatmul.mubr.f32.gmra.mxu1 %v1509_v52  ;;  %v1772_v52 = vld [vmem:[#allocation10 + $0x8] sm:$0xff]  ;;  %v1866_v3 = vld [vmem:[#allocation10 + $0x20] sm:$0xff] }
 0x539   :  { %v1512_v6 = vmax.f32 %v1500_v50, 0.0  ;;  %v1478_v7 = vadd.f32 %v1456_v36, %v5516_v34  ;;  %v1501_v9 = vadd.f32 %v1488_v42, %v1477_v5  ;;  %v4133_v50 = vld [vmem:[%s6227_s6 + $0x80] sm:$0xff]  ;;  %v1773_v5 = vld [vmem:[#allocation10 + $0x10] sm:$0xff]  ;;  %v1867_v36 = vld [vmem:[#allocation10 + $0x28] sm:$0xff] }
 0x53a   :  { %v1460_v10 = vpop.f32.mrf.mxu1 }
 0x53b   :  { %v1502_v28 = vadd.f32 %v1492_v58, %v1478_v7  ;;  %v1479_v12 = vadd.f32 %v1460_v10, %v5519_v37  ;;  %4107 = vmatprep.mubr.msk.f32.mxu0 %vm1537_vm3, %v1512_v6  ;;  %4113 = vmatprep.mubr.msk.f32.mxu1 %vm1537_vm3, %v1512_v6  ;;  %v1513_v18 = vmax.f32 %v1501_v9, 0.0  ;;  %v1968_v6 = vld [vmem:[%s6227_s6 + $0x30] sm:$0xff]  ;;  %v4132_v7 = vld [vmem:[%s6227_s6 + $0x78] sm:$0xff]  ;;  %v1966_v10 = vld [vmem:[%s6227_s6 + $0x20] sm:$0xff] }
 0x53c   :  { %v1462_v31 = vpop.f32.mrf.mxu1  ;;  %1631 = vmatmul.mubr.f32.gmra.mxu0 %v1511_v8  ;;  %1745 = vmatmul.mubr.f32.gmra.mxu1 %v1511_v8  ;;  %v1967_v8 = vld [vmem:[%s6227_s6 + $0x28] sm:$0xff]  ;;  %v4131_v9 = vld [vmem:[%s6227_s6 + $0x70] sm:$0xff] }
 0x53d   :  { %v1514_v13 = vmax.f32 %v1502_v28, 0.0  ;;  %v1480_v17 = vadd.f32 %v1462_v31, %v5522_v40  ;;  %v1503_v19 = vadd.f32 %v1488_v42, %v1479_v12  ;;  %v4130_v28 = vld [vmem:[%s6227_s6 + $0x68] sm:$0xff]  ;;  %v1965_v12 = vld [vmem:[%s6227_s6 + $0x18] sm:$0xff]  ;;  %v4129_v31 = vld [vmem:[%s6227_s6 + $0x60] sm:$0xff] }
 0x53e   :  { %v1466_v20 = vpop.f32.mrf.mxu1 }
 0x53f   :  { %v1504_v34 = vadd.f32 %v1492_v58, %v1480_v17  ;;  %v1481_v21 = vadd.f32 %v1466_v20, %v5525_v11  ;;  %4108 = vmatprep.mubr.msk.f32.mxu0 %vm1537_vm3, %v1514_v13  ;;  %4114 = vmatprep.mubr.msk.f32.mxu1 %vm1537_vm3, %v1514_v13  ;;  %v1515_v15 = vmax.f32 %v1503_v19, 0.0  ;;  %v1964_v13 = vld [vmem:[%s6227_s6 + $0x10] sm:$0xff]  ;;  %v4128_v17 = vld [vmem:[%s6227_s6 + $0x58] sm:$0xff]  ;;  %v1962_v20 = vld [vmem:[%s6227_s6] sm:$0xff] }
 0x540   :  { %v1468_v37 = vpop.f32.mrf.mxu1  ;;  %1636 = vmatmul.mubr.f32.gmra.mxu0 %v1513_v18  ;;  %1750 = vmatmul.mubr.f32.gmra.mxu1 %v1513_v18  ;;  %v1963_v18 = vld [vmem:[%s6227_s6 + $0x8] sm:$0xff]  ;;  %v4127_v19 = vld [vmem:[%s6227_s6 + $0x50] sm:$0xff] }
 0x541   :  { %v1516_v22 = vmax.f32 %v1504_v34, 0.0  ;;  %v1482_v23 = vadd.f32 %v1468_v37, %v5528_v14  ;;  %v1505_v16 = vadd.f32 %v1488_v42, %v1481_v21  ;;  %v4126_v34 = vld [vmem:[%s6227_s6 + $0x48] sm:$0xff] }
 0x543   :  { %v1506_v25 = vadd.f32 %v1492_v58, %v1482_v23  ;;  %4109 = vmatprep.mubr.msk.f32.mxu0 %vm1537_vm3, %v1516_v22  ;;  %4115 = vmatprep.mubr.msk.f32.mxu1 %vm1537_vm3, %v1516_v22  ;;  %v1517_v11 = vmax.f32 %v1505_v16, 0.0 }
 0x544   :  { %1641 = vmatmul.mubr.f32.gmra.mxu0 %v1515_v15  ;;  %1755 = vmatmul.mubr.f32.gmra.mxu1 %v1515_v15 }
 0x545   :  { %v1518_v40 = vmax.f32 %v1506_v25, 0.0 }
 0x547   :  { %4110 = vmatprep.mubr.msk.f32.mxu0 %vm1537_vm3, %v1518_v40  ;;  %4116 = vmatprep.mubr.msk.f32.mxu1 %vm1537_vm3, %v1518_v40 }
 0x548   :  { %1646 = vmatmul.mubr.f32.gmra.mxu0 %v1517_v11  ;;  %1760 = vmatmul.mubr.f32.gmra.mxu1 %v1517_v11 }
 0x549   :  { %4448 = vmatprep.mubr.msk.f32.mxu0 %vm5100_vm4, %v5099_v0  ;;  %4469 = vmatprep.mubr.msk.f32.mxu1 %vm5100_vm4, %v5099_v0 }
 0x5f4   :  { %v1622_v14 = vpop.f32.mrf.mxu0  ;;  %v1736_v26 = vpop.f32.mrf.mxu1 }
 0x5f5   :  { %v1765_v2 = vmax.f32 %v1622_v14, %v1736_v26 }
 0x5f6   :  { %v1624_v29 = vpop.f32.mrf.mxu0  ;;  %v1738_v32 = vpop.f32.mrf.mxu1 }
 0x5f8   :  { %v1627_v35 = vpop.f32.mrf.mxu0  ;;  %v1741_v41 = vpop.f32.mrf.mxu1 }
 0x5f9   :  { %v1766_v1 = vmax.f32 %v1627_v35, %v1741_v41 }
 0x5fa   :  { %v1629_v44 = vpop.f32.mrf.mxu0  ;;  %v1743_v47 = vpop.f32.mrf.mxu1 }
 0x5fb   :  { %v2062_v44 = vld [vmem:[#allocation11 + $0x10] sm:$0xff]  ;;  %v1960_v47 = vld [vmem:[#allocation11] sm:$0xff] }
 0x5fc   :  { %v1632_v33 = vpop.f32.mrf.mxu0  ;;  %v1746_v53 = vpop.f32.mrf.mxu1 }
 0x5fd   :  { %v1767_v63 = vmax.f32 %v1632_v33, %v1746_v53 }
 0x5fe   :  { %v1634_v39 = vpop.f32.mrf.mxu0  ;;  %v1748_v54 = vpop.f32.mrf.mxu1 }
 0x600   :  { %v1637_v55 = vpop.f32.mrf.mxu0  ;;  %v1751_v56 = vpop.f32.mrf.mxu1 }
 0x601   :  { %v1768_v30 = vmax.f32 %v1637_v55, %v1751_v56 }
 0x602   :  { %v1639_v42 = vpop.f32.mrf.mxu0  ;;  %v1753_v57 = vpop.f32.mrf.mxu1 }
 0x604   :  { %v1642_v58 = vpop.f32.mrf.mxu0  ;;  %v1756_v59 = vpop.f32.mrf.mxu1 }
 0x605   :  { %v1769_v48 = vmax.f32 %v1642_v58, %v1756_v59 }
 0x606   :  { %v1644_v24 = vpop.f32.mrf.mxu0  ;;  %v1758_v45 = vpop.f32.mrf.mxu1 }
 0x608   :  { %v1647_v60 = vpop.f32.mrf.mxu0  ;;  %v1761_v61 = vpop.f32.mrf.mxu1 }
 0x609   :  { %v1770_v27 = vmax.f32 %v1647_v60, %v1761_v61  ;;  %v2063_v60 = vld [vmem:[#allocation11 + $0x18] sm:$0xff] }
 0x60a   :  { %v1649_v62 = vpop.f32.mrf.mxu0  ;;  %v1763_v49 = vpop.f32.mrf.mxu1  ;;  %v4150_v61 = vld [vmem:[%s6227_s6 + $0xd0] sm:$0xff] }
 0x60b   :  { %4437 = vmatpush3.msra.mxu0 %v1770_v27  ;;  %4458 = vmatpush3.msra.mxu1 %v1770_v27  ;;  %v1961_v27 = vld [vmem:[#allocation11 + $0x8] sm:$0xff]  ;;  %v4149_v62 = vld [vmem:[%s6227_s6 + $0xc8] sm:$0xff] }
 0x60c   :  { %4438 = vmatprep.subr.mxu0 %v5099_v0  ;;  %4459 = vmatprep.subr.mxu1 %v5099_v0  ;;  %v4148_v49 = vld [vmem:[%s6227_s6 + $0xc0] sm:$0xff] }
 0x60d   :  { %4439 = vmatpush3.msra.mxu0 %v1769_v48  ;;  %4460 = vmatpush3.msra.mxu1 %v1769_v48  ;;  %v4147_v48 = vld [vmem:[%s6227_s6 + $0xb8] sm:$0xff] }
 0x60e   :  { %4440 = vmatprep.subr.mxu0 %v5099_v0  ;;  %4461 = vmatprep.subr.mxu1 %v5099_v0 }
 0x60f   :  { %4441 = vmatpush3.msra.mxu0 %v1768_v30  ;;  %4462 = vmatpush3.msra.mxu1 %v1768_v30  ;;  %v4146_v30 = vld [vmem:[%s6227_s6 + $0xb0] sm:$0xff] }
 0x610   :  { %4442 = vmatprep.subr.mxu0 %v5099_v0  ;;  %4463 = vmatprep.subr.mxu1 %v5099_v0 }
 0x611   :  { %4443 = vmatpush3.msra.mxu0 %v1767_v63  ;;  %4464 = vmatpush3.msra.mxu1 %v1767_v63  ;;  %v4145_v63 = vld [vmem:[%s6227_s6 + $0xa8] sm:$0xff] }
 0x612   :  { %4444 = vmatprep.subr.mxu0 %v5099_v0  ;;  %4465 = vmatprep.subr.mxu1 %v5099_v0 }
 0x613   :  { %4445 = vmatpush3.msra.mxu0 %v1766_v1  ;;  %4466 = vmatpush3.msra.mxu1 %v1766_v1  ;;  %v4144_v1 = vld [vmem:[%s6227_s6 + $0xa0] sm:$0xff] }
 0x614   :  { %4446 = vmatprep.subr.mxu0 %v5099_v0  ;;  %4467 = vmatprep.subr.mxu1 %v5099_v0 }
 0x615   :  { %4447 = vmatpush3.msra.mxu0 %v1765_v2  ;;  %4468 = vmatpush3.msra.mxu1 %v1765_v2  ;;  %v4143_v2 = vld [vmem:[%s6227_s6 + $0x98] sm:$0xff] }
 0x616   :  { %4449 = vmatmul.mubr.msk.f32.vlgmr.msra.gmra.mxu0 %vm1774_vm5, %v1771_v38  ;;  %4470 = vmatmul.mubr.msk.f32.vlgmr.msra.gmra.mxu1 %vm1774_vm5, %v1865_v43  ;;  %v4142_v38 = vld [vmem:[%s6227_s6 + $0x90] sm:$0xff]  ;;  %v2318_v43 = vld [vmem:[#allocation11 + $0x20] sm:$0xff] }
 0x617   :  { %4451 = vmatprep.mubr.msk.f32.mxu0 %vm5100_vm4, %v5099_v0  ;;  %4472 = vmatprep.mubr.msk.f32.mxu1 %vm5100_vm4, %v5099_v0 }
 0x618   :  { %4478 = vmatprep.subr.mxu0 %v5099_v0  ;;  %4505 = vmatprep.subr.mxu1 %v5099_v0 }
 0x619   :  { %4479 = vmatpush3.msra.mxu0 %v1970_v51  ;;  %4506 = vmatpush3.msra.mxu1 %v4134_v46 }
 0x61a   :  { %4452 = vmatmul.mubr.msk.f32.gmra.mxu0 %vm1774_vm5, %v1772_v52  ;;  %4473 = vmatmul.mubr.msk.f32.gmra.mxu1 %vm1774_vm5, %v1866_v3 }
 0x61b   :  { %4454 = vmatprep.mubr.msk.f32.mxu0 %vm5100_vm4, %v5099_v0  ;;  %4475 = vmatprep.mubr.msk.f32.mxu1 %vm5100_vm4, %v5099_v0 }
 0x61c   :  { %4480 = vmatprep.subr.mxu0 %v5099_v0  ;;  %4507 = vmatprep.subr.mxu1 %v5099_v0 }
 0x61d   :  { %4481 = vmatpush3.msra.mxu0 %v1969_v4  ;;  %4508 = vmatpush3.msra.mxu1 %v4133_v50 }
 0x61e   :  { %4455 = vmatmul.mubr.msk.f32.gmra.mxu0 %vm1774_vm5, %v1773_v5  ;;  %4476 = vmatmul.mubr.msk.f32.gmra.mxu1 %vm1774_vm5, %v1867_v36 }
 0x61f   :  { %4482 = vmatprep.subr.mxu0 %v5099_v0  ;;  %4509 = vmatprep.subr.mxu1 %v5099_v0 }
 0x620   :  { %4483 = vmatpush3.msra.mxu0 %v1968_v6  ;;  %4510 = vmatpush3.msra.mxu1 %v4132_v7 }
 0x621   :  { %4484 = vmatprep.subr.mxu0 %v5099_v0  ;;  %4511 = vmatprep.subr.mxu1 %v5099_v0 }
 0x622   :  { %4485 = vmatpush3.msra.mxu0 %v1967_v8  ;;  %4512 = vmatpush3.msra.mxu1 %v4131_v9  ;;  %v2319_v8 = vld [vmem:[#allocation11 + $0x28] sm:$0xff]  ;;  %v4164_v9 = vld [vmem:[%s6227_s6 + $0x118] sm:$0xff] }
 0x623   :  { %4486 = vmatprep.subr.mxu0 %v5099_v0  ;;  %4513 = vmatprep.subr.mxu1 %v5099_v0 }
 0x624   :  { %4487 = vmatpush3.msra.mxu0 %v1966_v10  ;;  %4514 = vmatpush3.msra.mxu1 %v4130_v28  ;;  %v4163_v10 = vld [vmem:[%s6227_s6 + $0x110] sm:$0xff]  ;;  %v4162_v28 = vld [vmem:[%s6227_s6 + $0x108] sm:$0xff] }
 0x625   :  { %4488 = vmatprep.subr.mxu0 %v5099_v0  ;;  %4515 = vmatprep.subr.mxu1 %v5099_v0 }
 0x626   :  { %4489 = vmatpush3.msra.mxu0 %v1965_v12  ;;  %4516 = vmatpush3.msra.mxu1 %v4129_v31  ;;  %v4161_v12 = vld [vmem:[%s6227_s6 + $0x100] sm:$0xff]  ;;  %v4160_v31 = vld [vmem:[%s6227_s6 + $0xf8] sm:$0xff] }
 0x627   :  { %4490 = vmatprep.subr.mxu0 %v5099_v0  ;;  %4517 = vmatprep.subr.mxu1 %v5099_v0 }
 0x628   :  { %4491 = vmatpush3.msra.mxu0 %v1964_v13  ;;  %4518 = vmatpush3.msra.mxu1 %v4128_v17  ;;  %v4159_v13 = vld [vmem:[%s6227_s6 + $0xf0] sm:$0xff]  ;;  %v4158_v17 = vld [vmem:[%s6227_s6 + $0xe8] sm:$0xff] }
 0x629   :  { %4492 = vmatprep.subr.mxu0 %v5099_v0  ;;  %4519 = vmatprep.subr.mxu1 %v5099_v0 }
 0x62a   :  { %4496 = vmatprep.mubr.msk.f32.mxu0 %vm5100_vm4, %v5099_v0  ;;  %4523 = vmatprep.mubr.msk.f32.mxu1 %vm5100_vm4, %v5099_v0 }
 0x62b   :  { %4493 = vmatpush3.msra.mxu0 %v1963_v18  ;;  %4520 = vmatpush3.msra.mxu1 %v4127_v19  ;;  %v4157_v18 = vld [vmem:[%s6227_s6 + $0xe0] sm:$0xff]  ;;  %v4156_v19 = vld [vmem:[%s6227_s6 + $0xd8] sm:$0xff] }
 0x62c   :  { %4494 = vmatprep.subr.mxu0 %v5099_v0  ;;  %4521 = vmatprep.subr.mxu1 %v5099_v0 }
 0x62d   :  { %4495 = vmatpush3.msra.mxu0 %v1962_v20  ;;  %4522 = vmatpush3.msra.mxu1 %v4126_v34  ;;  %v4178_v20 = vld [vmem:[%s6227_s6 + $0x160] sm:$0xff]  ;;  %v4177_v34 = vld [vmem:[%s6227_s6 + $0x158] sm:$0xff] }
 0x6d6   :  { %v1850_v21 = vpop.f32.mrf.mxu0  ;;  %v1943_v37 = vpop.f32.mrf.mxu1 }
 0x6d7   :  { %v5696_v22 = vmax.f32 %v1850_v21, %v1943_v37  ;;  %v4176_v21 = vld [vmem:[%s6227_s6 + $0x150] sm:$0xff]  ;;  %v4175_v37 = vld [vmem:[%s6227_s6 + $0x148] sm:$0xff] }
 0x6d8   :  { %v4450_v23 = vpop.f32.mrf.mxu0  ;;  %v4471_v15 = vpop.f32.mrf.mxu1 }
 0x6d9   :  { %4497 = vmatmul.mubr.msk.f32.vlgmr.msra.gmra.mxu0 %vm1971_vm6, %v5696_v22  ;;  %4524 = vmatmul.mubr.msk.f32.vlgmr.msra.gmra.mxu1 %vm1971_vm6, %v5696_v22  ;;  %v4174_v23 = vld [vmem:[%s6227_s6 + $0x140] sm:$0xff]  ;;  %v4173_v15 = vld [vmem:[%s6227_s6 + $0x138] sm:$0xff] }
 0x6da   :  { %v1855_v16 = vpop.f32.mrf.mxu0  ;;  %v1948_v25 = vpop.f32.mrf.mxu1  ;;  %4499 = vmatprep.mubr.msk.f32.mxu0 %vm5100_vm4, %v5099_v0  ;;  %4526 = vmatprep.mubr.msk.f32.mxu1 %vm5100_vm4, %v5099_v0 }
 0x6db   :  { %v5706_v40 = vmax.f32 %v1855_v16, %v1948_v25  ;;  %v4172_v16 = vld [vmem:[%s6227_s6 + $0x130] sm:$0xff]  ;;  %v4171_v25 = vld [vmem:[%s6227_s6 + $0x128] sm:$0xff] }
 0x6dc   :  { %v4453_v11 = vpop.f32.mrf.mxu0  ;;  %v4474_v14 = vpop.f32.mrf.mxu1 }
 0x6dd   :  { %4500 = vmatmul.mubr.msk.f32.gmra.mxu0 %vm1971_vm6, %v5706_v40  ;;  %4527 = vmatmul.mubr.msk.f32.gmra.mxu1 %vm1971_vm6, %v5706_v40  ;;  %v4170_v11 = vld [vmem:[%s6227_s6 + $0x120] sm:$0xff]  ;;  %v2494_v14 = vld [vmem:[#allocation11 + $0x30] sm:$0xff] }
 0x6de   :  { %v1860_v26 = vpop.f32.mrf.mxu0  ;;  %v1953_v29 = vpop.f32.mrf.mxu1  ;;  %4502 = vmatprep.mubr.msk.f32.mxu0 %vm5100_vm4, %v5099_v0  ;;  %4529 = vmatprep.mubr.msk.f32.mxu1 %vm5100_vm4, %v5099_v0 }
 0x6df   :  { %v5716_v32 = vmax.f32 %v1860_v26, %v1953_v29 }
 0x6e0   :  { %v4456_v35 = vpop.f32.mrf.mxu0  ;;  %v4477_v41 = vpop.f32.mrf.mxu1 }
 0x6e1   :  { %4503 = vmatmul.mubr.msk.f32.gmra.mxu0 %vm1971_vm6, %v5716_v32  ;;  %4530 = vmatmul.mubr.msk.f32.gmra.mxu1 %vm1971_vm6, %v5716_v32 }
 0x6e2   :  { %4538 = vmatprep.mubr.msk.f32.mxu0 %vm2154_vm7, %v2062_v44  ;;  %4547 = vmatprep.mubr.msk.f32.mxu1 %vm2154_vm7, %v1960_v47 }
 0x799   :  { %v2047_v33 = vpop.f32.mrf.mxu0  ;;  %v2140_v53 = vpop.f32.mrf.mxu1 }
 0x79b   :  { %v4498_v39 = vpop.f32.mrf.mxu0  ;;  %v4525_v54 = vpop.f32.mrf.mxu1 }
 0x79c   :  { %v2495_v54 = vld [vmem:[#allocation11 + $0x38] sm:$0xff] }
 0x79d   :  { %v2052_v55 = vpop.f32.mrf.mxu0  ;;  %v2145_v56 = vpop.f32.mrf.mxu1 }
 0x79f   :  { %v4501_v42 = vpop.f32.mrf.mxu0  ;;  %v4528_v57 = vpop.f32.mrf.mxu1 }
 0x7a1   :  { %v2057_v58 = vpop.f32.mrf.mxu0  ;;  %v2150_v59 = vpop.f32.mrf.mxu1 }
 0x7a2   :  { %4532 = vmatprep.subr.mxu0 %v2150_v59  ;;  %4541 = vmatprep.subr.mxu1 %v2057_v58 }
 0x7a3   :  { %4533 = vmatpush3.msra.mxu0 %v2150_v59  ;;  %4542 = vmatpush3.msra.mxu1 %v2057_v58  ;;  %v4504_v24 = vpop.f32.mrf.mxu0  ;;  %v4531_v45 = vpop.f32.mrf.mxu1 }
 0x7a4   :  { %4534 = vmatprep.subr.mxu0 %v2145_v56  ;;  %4543 = vmatprep.subr.mxu1 %v2052_v55  ;;  %v2671_v45 = vld [vmem:[#allocation11 + $0x48] sm:$0xff] }
 0x7a5   :  { %4535 = vmatpush3.msra.mxu0 %v2145_v56  ;;  %4544 = vmatpush3.msra.mxu1 %v2052_v55  ;;  %v2670_v55 = vld [vmem:[#allocation11 + $0x40] sm:$0xff] }
 0x7a6   :  { %4536 = vmatprep.subr.mxu0 %v2140_v53  ;;  %4545 = vmatprep.subr.mxu1 %v2047_v33 }
 0x7a7   :  { %4537 = vmatpush3.msra.mxu0 %v2140_v53  ;;  %4546 = vmatpush3.msra.mxu1 %v2047_v33 }
 0x7a8   :  { %4550 = vmatprep.subr.mxu0 %v5099_v0  ;;  %4539 = vmatmul.mubr.msk.f32.vlgmr.msra.gmra.mxu0 %vm2154_vm7, %v2063_v60  ;;  %v2867_v60 = vld [vmem:[%s6230_s9 + $0x58] sm:$0xff] }
 0x7a9   :  { %4551 = vmatpush3.msra.mxu0 %v4150_v61  ;;  %4548 = vmatmul.mubr.msk.f32.vlgmr.msra.gmra.mxu1 %vm2154_vm7, %v1961_v27  ;;  %v4198_v61 = vld [vmem:[%s6230_s9 + $0xb8] sm:$0xff]  ;;  %v2866_v27 = vld [vmem:[%s6230_s9 + $0x50] sm:$0xff] }
 0x7aa   :  { %4552 = vmatprep.subr.mxu0 %v5099_v0  ;;  %4568 = vmatprep.mubr.msk.f32.mxu0 %vm5100_vm4, %v5099_v0 }
 0x7ab   :  { %4553 = vmatpush3.msra.mxu0 %v4149_v62  ;;  %4583 = vmatprep.mubr.msk.f32.mxu1 %vm2154_vm7, %v2318_v43  ;;  %v4197_v62 = vld [vmem:[%s6230_s9 + $0xb0] sm:$0xff] }
 0x7ac   :  { %4554 = vmatprep.subr.mxu0 %v5099_v0  ;;  %v4193_v43 = vld [vmem:[%s6230_s9 + $0x90] sm:$0xff] }
 0x7ad   :  { %4555 = vmatpush3.msra.mxu0 %v4148_v49  ;;  %v2865_v49 = vld [vmem:[%s6230_s9 + $0x48] sm:$0xff] }
 0x7ae   :  { %4556 = vmatprep.subr.mxu0 %v5099_v0 }
 0x7af   :  { %4557 = vmatpush3.msra.mxu0 %v4147_v48  ;;  %v4196_v48 = vld [vmem:[%s6230_s9 + $0xa8] sm:$0xff] }
 0x7b0   :  { %4558 = vmatprep.subr.mxu0 %v5099_v0 }
 0x7b1   :  { %4559 = vmatpush3.msra.mxu0 %v4146_v30  ;;  %v2864_v30 = vld [vmem:[%s6230_s9 + $0x40] sm:$0xff] }
 0x7b2   :  { %4560 = vmatprep.subr.mxu0 %v5099_v0 }
 0x7b3   :  { %4561 = vmatpush3.msra.mxu0 %v4145_v63  ;;  %v4195_v63 = vld [vmem:[%s6230_s9 + $0xa0] sm:$0xff] }
 0x7b4   :  { %4562 = vmatprep.subr.mxu0 %v5099_v0 }
 0x7b5   :  { %4563 = vmatpush3.msra.mxu0 %v4144_v1  ;;  %v2863_v1 = vld [vmem:[%s6230_s9 + $0x38] sm:$0xff] }
 0x7b6   :  { %4564 = vmatprep.subr.mxu0 %v5099_v0 }
 0x7b7   :  { %4565 = vmatpush3.msra.mxu0 %v4143_v2  ;;  %v4194_v2 = vld [vmem:[%s6230_s9 + $0x98] sm:$0xff] }
 0x7b8   :  { %4566 = vmatprep.subr.mxu0 %v5099_v0 }
 0x7b9   :  { %4567 = vmatpush3.msra.mxu0 %v4142_v38  ;;  %v2862_v38 = vld [vmem:[%s6230_s9 + $0x30] sm:$0xff] }
 0x7ba   :  { %4569 = vmatmul.mubr.msk.f32.vlgmr.msra.gmra.mxu0 %vm1971_vm6, %v5696_v22 }
 0x7bb   :  { %4571 = vmatprep.mubr.msk.f32.mxu0 %vm5100_vm4, %v5099_v0 }
 0x7be   :  { %4572 = vmatmul.mubr.msk.f32.gmra.mxu0 %vm1971_vm6, %v5706_v40 }
 0x7bf   :  { %4574 = vmatprep.mubr.msk.f32.mxu0 %vm5100_vm4, %v5099_v0 }
 0x7c2   :  { %4575 = vmatmul.mubr.msk.f32.gmra.mxu0 %vm1971_vm6, %v5716_v32 }
 0x7c3   :  { %4619 = vmatprep.mubr.msk.f32.mxu0 %vm2154_vm7, %v2494_v14 }
 0x868   :  { %v4540_v51 = vpop.f32.mrf.mxu0 }
 0x869   :  { %v4549_v46 = vpop.f32.mrf.mxu1 }
 0x86a   :  { %v5775_v52 = vadd.f32 %v4549_v46, %v4540_v51  ;;  %v5777_v3 = vpop.f32.mrf.mxu0  ;;  %v2861_v51 = vld [vmem:[%s6230_s9 + $0x28] sm:$0xff] }
 0x86b   :  { %v2308_v26 = vpop.f32.mrf.mxu1  ;;  %v4192_v46 = vld [vmem:[%s6230_s9 + $0x88] sm:$0xff] }
 0x86c   :  { %v2309_v35 = vadd.f32 %v2308_v26, %v5777_v3  ;;  %v4191_v3 = vld [vmem:[%s6230_s9 + $0x80] sm:$0xff] }
 0x87a   :  { %v2396_v4 = vpop.f32.mrf.mxu0 }
 0x87c   :  { %v4570_v50 = vpop.f32.mrf.mxu0 }
 0x87d   :  { %v4190_v50 = vld [vmem:[%s6230_s9 + $0x78] sm:$0xff] }
 0x87e   :  { %v2401_v5 = vpop.f32.mrf.mxu0 }
 0x880   :  { %v4573_v36 = vpop.f32.mrf.mxu0 }
 0x881   :  { %v4189_v36 = vld [vmem:[%s6230_s9 + $0x70] sm:$0xff] }
 0x882   :  { %v2406_v6 = vpop.f32.mrf.mxu0 }
 0x883   :  { %4577 = vmatprep.subr.mxu1 %v2406_v6 }
 0x884   :  { %v4576_v7 = vpop.f32.mrf.mxu0  ;;  %4578 = vmatpush3.msra.mxu1 %v2406_v6  ;;  %v2857_v6 = vld [vmem:[%s6230_s9 + $0x8] sm:$0xff] }
 0x885   :  { %4579 = vmatprep.subr.mxu1 %v2401_v5  ;;  %v4188_v7 = vld [vmem:[%s6230_s9 + $0x68] sm:$0xff] }
 0x886   :  { %4580 = vmatpush3.msra.mxu1 %v2401_v5  ;;  %v2858_v5 = vld [vmem:[%s6230_s9 + $0x10] sm:$0xff] }
 0x887   :  { %4581 = vmatprep.subr.mxu1 %v2396_v4 }
 0x888   :  { %4582 = vmatpush3.msra.mxu1 %v2396_v4  ;;  %v2859_v4 = vld [vmem:[%s6230_s9 + $0x18] sm:$0xff] }
 0x889   :  { %4584 = vmatmul.mubr.msk.f32.vlgmr.msra.gmra.mxu1 %vm2154_vm7, %v2319_v8  ;;  %4586 = vmatprep.subr.mxu1 %v5099_v0  ;;  %v2856_v8 = vld [vmem:[%s6230_s9] sm:$0xff] }
 0x88a   :  { %4587 = vmatpush3.msra.mxu1 %v4164_v9  ;;  %4604 = vmatprep.mubr.msk.f32.mxu1 %vm5100_vm4, %v5099_v0  ;;  %v4187_v9 = vld [vmem:[%s6230_s9 + $0x60] sm:$0xff] }
 0x88b   :  { %4588 = vmatprep.subr.mxu1 %v5099_v0 }
 0x88c   :  { %4589 = vmatpush3.msra.mxu1 %v4163_v10 }
 0x88d   :  { %4590 = vmatprep.subr.mxu1 %v5099_v0 }
 0x88e   :  { %4591 = vmatpush3.msra.mxu1 %v4162_v28 }
 0x88f   :  { %4592 = vmatprep.subr.mxu1 %v5099_v0 }
 0x890   :  { %4593 = vmatpush3.msra.mxu1 %v4161_v12 }
 0x891   :  { %4594 = vmatprep.subr.mxu1 %v5099_v0 }
 0x892   :  { %4595 = vmatpush3.msra.mxu1 %v4160_v31 }
 0x893   :  { %4596 = vmatprep.subr.mxu1 %v5099_v0 }
 0x894   :  { %4597 = vmatpush3.msra.mxu1 %v4159_v13 }
 0x895   :  { %4598 = vmatprep.subr.mxu1 %v5099_v0 }
 0x896   :  { %4599 = vmatpush3.msra.mxu1 %v4158_v17 }
 0x897   :  { %4600 = vmatprep.subr.mxu1 %v5099_v0 }
 0x898   :  { %4601 = vmatpush3.msra.mxu1 %v4157_v18  ;;  %v4184_v18 = vld [vmem:[%s6229_s8] ss:$0 sm:$0xff] }
 0x899   :  { %4602 = vmatprep.subr.mxu1 %v5099_v0 }
 0x89a   :  { %4603 = vmatpush3.msra.mxu1 %v4156_v19 }
 0x89b   :  { %4605 = vmatmul.mubr.msk.f32.vlgmr.msra.gmra.mxu1 %vm1971_vm6, %v5696_v22  ;;  %4622 = vmatprep.subr.mxu1 %v5099_v0 }
 0x89c   :  { %4623 = vmatpush3.msra.mxu1 %v4178_v20  ;;  %4607 = vmatprep.mubr.msk.f32.mxu1 %vm5100_vm4, %v5099_v0 }
 0x89d   :  { %4624 = vmatprep.subr.mxu1 %v5099_v0 }
 0x89e   :  { %4625 = vmatpush3.msra.mxu1 %v4177_v34 }
 0x89f   :  { %4608 = vmatmul.mubr.msk.f32.gmra.mxu1 %vm1971_vm6, %v5706_v40  ;;  %4626 = vmatprep.subr.mxu1 %v5099_v0 }
 0x8a0   :  { %4627 = vmatpush3.msra.mxu1 %v4176_v21  ;;  %4610 = vmatprep.mubr.msk.f32.mxu1 %vm5100_vm4, %v5099_v0 }
 0x8a1   :  { %4628 = vmatprep.subr.mxu1 %v5099_v0 }
 0x8a2   :  { %4629 = vmatpush3.msra.mxu1 %v4175_v37 }
 0x8a3   :  { %4611 = vmatmul.mubr.msk.f32.gmra.mxu1 %vm1971_vm6, %v5716_v32  ;;  %4630 = vmatprep.subr.mxu1 %v5099_v0 }
 0x8a4   :  { %4631 = vmatpush3.msra.mxu1 %v4174_v23  ;;  %4640 = vmatprep.mubr.msk.f32.mxu1 %vm5100_vm4, %v5099_v0 }
 0x8a5   :  { %4632 = vmatprep.subr.mxu1 %v5099_v0 }
 0x8a6   :  { %4633 = vmatpush3.msra.mxu1 %v4173_v15 }
 0x8a7   :  { %4634 = vmatprep.subr.mxu1 %v5099_v0 }
 0x8a8   :  { %4635 = vmatpush3.msra.mxu1 %v4172_v16 }
 0x8a9   :  { %4636 = vmatprep.subr.mxu1 %v5099_v0 }
 0x8aa   :  { %4637 = vmatpush3.msra.mxu1 %v4171_v25 }
 0x8ab   :  { %4638 = vmatprep.subr.mxu1 %v5099_v0 }
 0x8ac   :  { %4639 = vmatpush3.msra.mxu1 %v4170_v11 }
 0x8ad   :  { %4641 = vmatmul.mubr.msk.f32.vlgmr.msra.gmra.mxu1 %vm1971_vm6, %v5696_v22  ;;  %4685 = vmatprep.subr.mxu1 %v4198_v61 }
 0x8ae   :  { %4643 = vmatprep.mubr.msk.f32.mxu1 %vm5100_vm4, %v5099_v0  ;;  %4686 = vmatpush3.msra.mxu1 %v4198_v61 }
 0x8af   :  { %4687 = vmatprep.subr.mxu1 %v4197_v62 }
 0x8b0   :  { %4688 = vmatpush3.msra.mxu1 %v4197_v62  ;;  %v4221_v62 = vld [vmem:[%s6233_s12 + $0x88] sm:$0xff] }
 0x8b1   :  { %4644 = vmatmul.mubr.msk.f32.gmra.mxu1 %vm1971_vm6, %v5706_v40  ;;  %4689 = vmatprep.subr.mxu1 %v4196_v48 }
 0x8b2   :  { %4646 = vmatprep.mubr.msk.f32.mxu1 %vm5100_vm4, %v5099_v0  ;;  %4690 = vmatpush3.msra.mxu1 %v4196_v48 }
 0x8b3   :  { %4691 = vmatprep.subr.mxu1 %v4195_v63 }
 0x8b4   :  { %4692 = vmatpush3.msra.mxu1 %v4195_v63 }
 0x8b5   :  { %4647 = vmatmul.mubr.msk.f32.gmra.mxu1 %vm1971_vm6, %v5716_v32  ;;  %4693 = vmatprep.subr.mxu1 %v4194_v2 }
 0x8b6   :  { %4694 = vmatpush3.msra.mxu1 %v4194_v2  ;;  %v4223_v2 = vld [vmem:[%s6232_s11 + $0x6] sm:$0x3] }
 0x8b7   :  { %4695 = vmatprep.subr.mxu1 %v4193_v43 }
 0x8b8   :  { %4696 = vmatpush3.msra.mxu1 %v4193_v43  ;;  %v4218_v43 = vld [vmem:[%s6233_s12 + $0x70] sm:$0xff] }
 0x8b9   :  { %4697 = vmatprep.subr.mxu1 %v4192_v46 }
 0x8ba   :  { %4698 = vmatpush3.msra.mxu1 %v4192_v46  ;;  %v4217_v46 = vld [vmem:[%s6233_s12 + $0x68] sm:$0xff] }
 0x8bb   :  { %4699 = vmatprep.subr.mxu1 %v4191_v3 }
 0x8bc   :  { %4700 = vmatpush3.msra.mxu1 %v4191_v3  ;;  %v4216_v3 = vld [vmem:[%s6233_s12 + $0x60] sm:$0xff] }
 0x8bd   :  { %4701 = vmatprep.subr.mxu1 %v4190_v50 }
 0x8be   :  { %4702 = vmatpush3.msra.mxu1 %v4190_v50  ;;  %v4226_v50 = vld [vmem:[%s6233_s12 + $0x98] sm:$0xff] }
 0x8bf   :  { %4703 = vmatprep.subr.mxu1 %v4189_v36 }
 0x8c0   :  { %4704 = vmatpush3.msra.mxu1 %v4189_v36 }
 0x8c1   :  { %4705 = vmatprep.subr.mxu1 %v4188_v7 }
 0x8c2   :  { %4706 = vmatpush3.msra.mxu1 %v4188_v7 }
 0x8c3   :  { %4707 = vmatprep.subr.mxu1 %v4187_v9 }
 0x8c4   :  { %4708 = vmatpush3.msra.mxu1 %v4187_v9 }
 0x8c5   :  { %4712 = vmatprep.subr.mxu1 %v5099_v0 }
 0x949   :  { %v4585_v29 = vpop.f32.mrf.mxu1 }
 0x94a   :  { %v5879_v22 = vadd.f32 %v4585_v29, %v5775_v52  ;;  %v2860_v52 = vld [vmem:[%s6230_s9 + $0x20] sm:$0xff]  ;;  %v3040_v29 = vld [vmem:[#allocation13] sm:$0xff] }
 0x94b   :  { %v2482_v41 = vpop.f32.mrf.mxu1 }
 0x94c   :  { %v5881_v44 = vadd.f32 %v2482_v41, %v2309_v35  ;;  %v3115_v35 = vld [vmem:[#allocation13 + $0x8] sm:$0xff] }
 0x95b   :  { %v2572_v40 = vpop.f32.mrf.mxu1 }
 0x95d   :  { %v4606_v47 = vpop.f32.mrf.mxu1 }
 0x95e   :  { %v3190_v47 = vld [vmem:[%s6232_s11] sm:$0x3] }
 0x95f   :  { %v2577_v33 = vpop.f32.mrf.mxu1 }
 0x961   :  { %v4609_v53 = vpop.f32.mrf.mxu1 }
 0x963   :  { %v2582_v39 = vpop.f32.mrf.mxu1 }
 0x964   :  { %4613 = vmatprep.subr.mxu0 %v2582_v39 }
 0x965   :  { %v4612_v32 = vpop.f32.mrf.mxu1  ;;  %4614 = vmatpush3.msra.mxu0 %v2582_v39  ;;  %v4211_v39 = vld [vmem:[%s6233_s12 + $0x58] sm:$0xff] }
 0x966   :  { %4615 = vmatprep.subr.mxu0 %v2577_v33  ;;  %v4210_v32 = vld [vmem:[%s6233_s12 + $0x50] sm:$0xff] }
 0x967   :  { %4616 = vmatpush3.msra.mxu0 %v2577_v33 }
 0x968   :  { %4617 = vmatprep.subr.mxu0 %v2572_v40 }
 0x969   :  { %4618 = vmatpush3.msra.mxu0 %v2572_v40  ;;  %v4204_v40 = vld [vmem:[%s6232_s11 + $0x2] sm:$0x3] }
 0x96a   :  { %4620 = vmatmul.mubr.msk.f32.vlgmr.msra.gmra.mxu0 %vm2154_vm7, %v2495_v54  ;;  %v4209_v54 = vld [vmem:[%s6233_s12 + $0x48] sm:$0xff] }
 0x96b   :  { %4655 = vmatprep.mubr.msk.f32.mxu0 %vm2154_vm7, %v2670_v55  ;;  %v4208_v55 = vld [vmem:[%s6233_s12 + $0x40] sm:$0xff] }
 0x96d   :  { %v2748_v56 = vpop.f32.mrf.mxu1 }
 0x96f   :  { %v4642_v42 = vpop.f32.mrf.mxu1 }
 0x970   :  { %v4206_v42 = vld [vmem:[%s6233_s12 + $0x30] sm:$0xff] }
 0x971   :  { %v2753_v57 = vpop.f32.mrf.mxu1 }
 0x973   :  { %v4645_v58 = vpop.f32.mrf.mxu1 }
 0x974   :  { %v3269_v58 = vld [vmem:[%s6233_s12 + $0x20] sm:$0xff] }
 0x975   :  { %v2758_v59 = vpop.f32.mrf.mxu1 }
 0x976   :  { %4649 = vmatprep.subr.mxu0 %v2758_v59 }
 0x977   :  { %v4648_v24 = vpop.f32.mrf.mxu1  ;;  %4650 = vmatpush3.msra.mxu0 %v2758_v59  ;;  %v3268_v59 = vld [vmem:[%s6233_s12 + $0x18] sm:$0xff] }
 0x978   :  { %4651 = vmatprep.subr.mxu0 %v2753_v57  ;;  %v3267_v24 = vld [vmem:[%s6233_s12 + $0x10] sm:$0xff] }
 0x979   :  { %4652 = vmatpush3.msra.mxu0 %v2753_v57  ;;  %v3270_v57 = vld [vmem:[%s6233_s12 + $0x28] sm:$0xff] }
 0x97a   :  { %4653 = vmatprep.subr.mxu0 %v2748_v56 }
 0x97b   :  { %4654 = vmatpush3.msra.mxu0 %v2748_v56  ;;  %v4207_v56 = vld [vmem:[%s6233_s12 + $0x38] sm:$0xff] }
 0x97c   :  { %4656 = vmatmul.mubr.msk.f32.vlgmr.msra.gmra.mxu0 %vm2154_vm7, %v2671_v45  ;;  %4658 = vmatprep.subr.mxu0 %v2867_v60  ;;  %v3266_v45 = vld [vmem:[%s6233_s12 + $0x8] sm:$0xff] }
 0x97d   :  { %4659 = vmatpush3.msra.mxu0 %v2867_v60  ;;  %v3265_v60 = vld [vmem:[%s6233_s12] sm:$0xff] }
 0x97e   :  { %4660 = vmatprep.subr.mxu0 %v2866_v27 }
 0x97f   :  { %4661 = vmatpush3.msra.mxu0 %v2866_v27 }
 0x980   :  { %4662 = vmatprep.subr.mxu0 %v2865_v49 }
 0x981   :  { %4663 = vmatpush3.msra.mxu0 %v2865_v49  ;;  %v4214_v49 = vld [vmem:[%s6232_s11 + $0x4] sm:$0x3] }
 0x982   :  { %4664 = vmatprep.subr.mxu0 %v2864_v30 }
 0x983   :  { %4665 = vmatpush3.msra.mxu0 %v2864_v30  ;;  %v4220_v30 = vld [vmem:[%s6233_s12 + $0x80] sm:$0xff] }
 0x984   :  { %4666 = vmatprep.subr.mxu0 %v2863_v1 }
 0x985   :  { %4667 = vmatpush3.msra.mxu0 %v2863_v1  ;;  %v4219_v1 = vld [vmem:[%s6233_s12 + $0x78] sm:$0xff] }
 0x986   :  { %4668 = vmatprep.subr.mxu0 %v2862_v38 }
 0x987   :  { %4669 = vmatpush3.msra.mxu0 %v2862_v38  ;;  %v4230_v38 = vld [vmem:[%s6233_s12 + $0xb8] sm:$0xff] }
 0x988   :  { %4670 = vmatprep.subr.mxu0 %v2861_v51 }
 0x989   :  { %4671 = vmatpush3.msra.mxu0 %v2861_v51  ;;  %v4229_v51 = vld [vmem:[%s6233_s12 + $0xb0] sm:$0xff] }
 0x98a   :  { %4672 = vmatprep.subr.mxu0 %v2860_v52 }
 0x98b   :  { %4673 = vmatpush3.msra.mxu0 %v2860_v52  ;;  %v4228_v52 = vld [vmem:[%s6233_s12 + $0xa8] sm:$0xff] }
 0x98c   :  { %4674 = vmatprep.subr.mxu0 %v2859_v4 }
 0x98d   :  { %4675 = vmatpush3.msra.mxu0 %v2859_v4  ;;  %v4227_v4 = vld [vmem:[%s6233_s12 + $0xa0] sm:$0xff] }
 0x98e   :  { %4676 = vmatprep.subr.mxu0 %v2858_v5 }
 0x98f   :  { %4677 = vmatpush3.msra.mxu0 %v2858_v5  ;;  %v4225_v5 = vld [vmem:[%s6233_s12 + $0x90] sm:$0xff] }
 0x990   :  { %4678 = vmatprep.subr.mxu0 %v2857_v6 }
 0x991   :  { %4679 = vmatpush3.msra.mxu0 %v2857_v6 }
 0x992   :  { %4680 = vmatprep.subr.mxu0 %v2856_v8 }
 0x993   :  { %4681 = vmatpush3.msra.mxu0 %v2856_v8 }
 0x994   :  { %4719 = vmatprep.subr.mxu0 %v5099_v0 }
 0xa2a   :  { %v4621_v10 = vpop.f32.mrf.mxu0 }
 0xa2b   :  { %v2668_v12 = vadd.f32 %v4621_v10, %v5879_v22  ;;  %v3834_v10 = vld [vmem:[%s6235_s14 + $0x70] sm:$0xff] }
 0xa2c   :  { %v2658_v28 = vpop.f32.mrf.mxu0 }
 0xa2d   :  { %v2667_v13 = vadd.f32 %v2658_v28, %v5881_v44 }
 0xa3c   :  { %v4657_v31 = vpop.f32.mrf.mxu0 }
 0xa3d   :  { %v2844_v17 = vadd.f32 %v4657_v31, %v2668_v12  ;;  %v3833_v12 = vld [vmem:[%s6235_s14 + $0x68] sm:$0xff] }
 0xa3e   :  { %v2834_v19 = vpop.f32.mrf.mxu0 }
 0xa3f   :  { %v2843_v20 = vadd.f32 %v2834_v19, %v2667_v13  ;;  %v2853_v34 = vadd.f32 %v4184_v18, %v2844_v17  ;;  %v3832_v13 = vld [vmem:[%s6235_s14 + $0x60] sm:$0xff] }
 0xa41   :  { %v2852_v21 = vadd.f32 %v4184_v18, %v2843_v20  ;;  %v2855_v23 = vmax.f32 %v2853_v34, 0.0  ;;  %v3831_v18 = vld [vmem:[%s6235_s14 + $0x58] sm:$0xff]  ;;  %v3830_v20 = vld [vmem:[%s6235_s14 + $0x50] sm:$0xff]  ;;  %v3829_v34 = vld [vmem:[%s6235_s14 + $0x48] sm:$0xff] }
 0xa43   :  { %v2854_v37 = vmax.f32 %v2852_v21, 0.0  ;;  %v3828_v21 = vld [vmem:[%s6235_s14 + $0x40] sm:$0xff] }
 0xa45   :  { %4682 = vmatprep.mubr.msk.f32.mxu0 %vm2868_vm8, %v2854_v37  ;;  %4709 = vmatprep.mubr.msk.f32.mxu1 %vm2868_vm8, %v2854_v37  ;;  %v3827_v37 = vld [vmem:[%s6235_s14 + $0x38] sm:$0xff] }
 0xa46   :  { %4683 = vmatmul.mubr.msk.f32.vlgmr.msra.gmra.mxu0 %vm2868_vm8, %v2855_v23  ;;  %4710 = vmatmul.mubr.msk.f32.vlgmr.msra.gmra.mxu1 %vm2868_vm8, %v2855_v23  ;;  %v3826_v23 = vld [vmem:[%s6235_s14 + $0x30] sm:$0xff] }
 0xa47   :  { %4716 = vmatprep.mubr.msk.f32.mxu1 %vm5100_vm4, %v5099_v0  ;;  %4723 = vmatprep.mubr.msk.f32.mxu0 %vm5100_vm4, %v5099_v0 }
 0xb06   :  { %v4684_v15 = vpop.f32.mrf.mxu0  ;;  %v4711_v16 = vpop.f32.mrf.mxu1 }
 0xb07   :  { %v3039_v25 = vmax.f32 %v4684_v15, %v4711_v16  ;;  %v3825_v15 = vld [vmem:[%s6235_s14 + $0x28] sm:$0xff]  ;;  %v3824_v16 = vld [vmem:[%s6235_s14 + $0x20] sm:$0xff] }
 0xb08   :  { %v2941_v11 = vpop.f32.mrf.mxu0  ;;  %v3029_v14 = vpop.f32.mrf.mxu1 }
 0xb09   :  { %v3038_v26 = vmax.f32 %v2941_v11, %v3029_v14  ;;  %4713 = vmatpush3.msra.mxu1 %v3039_v25  ;;  %4720 = vmatpush3.msra.mxu0 %v3039_v25  ;;  %v3823_v25 = vld [vmem:[%s6235_s14 + $0x18] sm:$0xff]  ;;  %v3822_v11 = vld [vmem:[%s6235_s14 + $0x10] sm:$0xff]  ;;  %v3821_v14 = vld [vmem:[%s6235_s14 + $0x8] sm:$0xff] }
 0xb0a   :  { %4714 = vmatprep.subr.mxu1 %v5099_v0  ;;  %4721 = vmatprep.subr.mxu0 %v5099_v0 }
 0xb0b   :  { %4715 = vmatpush3.msra.mxu1 %v3038_v26  ;;  %4722 = vmatpush3.msra.mxu0 %v3038_v26  ;;  %v3820_v26 = vld [vmem:[%s6235_s14] sm:$0xff] }
 0xb0c   :  { %4717 = vmatmul.mubr.msk.f32.vlgmr.msra.gmra.mxu1 %vm1537_vm3, %v3040_v29  ;;  %4724 = vmatmul.mubr.msk.f32.vlgmr.msra.gmra.mxu0 %vm1537_vm3, %v3115_v35  ;;  %v3924_v29 = vld [vmem:[%s6237_s16 + $0x38] sm:$0xf]  ;;  %v3923_v35 = vld [vmem:[%s6237_s16 + $0x30] sm:$0xff] }
 0xb0d   :  { %4731 = vmatprep.subr.mxu0 %v5099_v0  ;;  %4733 = vmatprep.mubr.msk.f32.mxu0 %vm5100_vm4, %v5099_v0 }
 0xb0e   :  { %4726 = vmatprep.subr.mxu1 %v5099_v0  ;;  %4728 = vmatprep.mubr.msk.f32.mxu1 %vm5100_vm4, %v5099_v0 }
 0xbcc   :  { %v3110_v22 = vpop.f32.mrf.mxu1  ;;  %v3185_v41 = vpop.f32.mrf.mxu0 }
 0xbcd   :  { %v5979_v44 = vmax.f32 %v3110_v22, %v3185_v41  ;;  %v3922_v22 = vld [vmem:[%s6237_s16 + $0x28] sm:$0xff]  ;;  %v3921_v41 = vld [vmem:[%s6237_s16 + $0x20] sm:$0xff] }
 0xbce   :  { %v4718_v33 = vpop.f32.mrf.mxu1  ;;  %v4725_v53 = vpop.f32.mrf.mxu0 }
 0xbcf   :  { %4732 = vmatpush3.msra.mxu0 %v5979_v44  ;;  %4727 = vmatpush3.msra.mxu1 %v5979_v44 }
 0xbd0   :  { %4734 = vmatmul.mubr.msk.f32.vlgmr.msra.gmra.mxu0 %vm3191_vm9, %v4204_v40  ;;  %4729 = vmatmul.mubr.msk.f32.vlgmr.msra.gmra.mxu1 %vm3191_vm9, %v3190_v47 }
 0xbd1   :  { %4736 = vmatprep.subr.mxu1 %v5099_v0  ;;  %4748 = vmatprep.mubr.msk.f32.mxu1 %vm5100_vm4, %v5099_v0 }
 0xbd2   :  { %4737 = vmatpush3.msra.mxu1 %v4211_v39  ;;  %4751 = vmatprep.subr.mxu0 %v5099_v0  ;;  %v4232_v39 = vld [vmem:[%s6234_s13] ss:$0 sm:$0xff] }
 0xbd3   :  { %4738 = vmatprep.subr.mxu1 %v5099_v0  ;;  %4763 = vmatprep.mubr.msk.f32.mxu0 %vm5100_vm4, %v5099_v0 }
 0xbd4   :  { %4739 = vmatpush3.msra.mxu1 %v4210_v32  ;;  %4752 = vmatpush3.msra.mxu0 %v3270_v57  ;;  %v3918_v57 = vld [vmem:[%s6237_s16 + $0x8] sm:$0xff] }
 0xbd5   :  { %4740 = vmatprep.subr.mxu1 %v5099_v0  ;;  %4753 = vmatprep.subr.mxu0 %v5099_v0 }
 0xbd6   :  { %4741 = vmatpush3.msra.mxu1 %v4209_v54  ;;  %4754 = vmatpush3.msra.mxu0 %v3269_v58  ;;  %v3917_v58 = vld [vmem:[%s6237_s16] sm:$0xff] }
 0xbd7   :  { %4742 = vmatprep.subr.mxu1 %v5099_v0  ;;  %4755 = vmatprep.subr.mxu0 %v5099_v0 }
 0xbd8   :  { %4743 = vmatpush3.msra.mxu1 %v4208_v55  ;;  %4756 = vmatpush3.msra.mxu0 %v3268_v59  ;;  %v4233_v59 = vld [vmem:[#allocation14] ss:$0 sm:$0xff] }
 0xbd9   :  { %4744 = vmatprep.subr.mxu1 %v5099_v0  ;;  %4757 = vmatprep.subr.mxu0 %v5099_v0 }
 0xbda   :  { %4745 = vmatpush3.msra.mxu1 %v4207_v56  ;;  %4758 = vmatpush3.msra.mxu0 %v3267_v24 }
 0xbdb   :  { %4746 = vmatprep.subr.mxu1 %v5099_v0  ;;  %4759 = vmatprep.subr.mxu0 %v5099_v0 }
 0xbdc   :  { %4747 = vmatpush3.msra.mxu1 %v4206_v42  ;;  %4760 = vmatpush3.msra.mxu0 %v3266_v45  ;;  %v3919_v42 = vld [vmem:[%s6237_s16 + $0x10] sm:$0xff] }
 0xbdd   :  { %4766 = vmatprep.subr.mxu1 %v5099_v0  ;;  %4761 = vmatprep.subr.mxu0 %v5099_v0 }
 0xbde   :  { %4762 = vmatpush3.msra.mxu0 %v3265_v60 }
 0xbdf   :  { %4771 = vmatprep.subr.mxu0 %v5099_v0 }
 0xc90   :  { %v3342_v61 = vpop.f32.mrf.mxu0  ;;  %v3261_v27 = vpop.f32.mrf.mxu1 }
 0xc91   :  { %4749 = vmatmul.mubr.msk.f32.vlgmr.msra.gmra.mxu1 %vm1774_vm5, %v3342_v61  ;;  %4764 = vmatmul.mubr.msk.f32.vlgmr.msra.gmra.mxu0 %vm1774_vm5, %v3261_v27  ;;  %v4235_v27 = vld [vmem:[#allocation16] ss:$0 sm:$0xff] }
 0xc92   :  { %4767 = vmatpush3.msra.mxu1 %v5979_v44  ;;  %4768 = vmatprep.mubr.msk.f32.mxu1 %vm5100_vm4, %v5099_v0  ;;  %v4735_v48 = vpop.f32.mrf.mxu0  ;;  %v4730_v63 = vpop.f32.mrf.mxu1 }
 0xc93   :  { %4786 = vmatprep.subr.mxu1 %v5099_v0  ;;  %4772 = vmatpush3.msra.mxu0 %v4221_v62 }
 0xc94   :  { %4773 = vmatprep.subr.mxu0 %v5099_v0  ;;  %4783 = vmatprep.mubr.msk.f32.mxu0 %vm5100_vm4, %v5099_v0 }
 0xc95   :  { %4769 = vmatmul.mubr.msk.f32.vlgmr.msra.gmra.mxu1 %vm3191_vm9, %v4214_v49  ;;  %4774 = vmatpush3.msra.mxu0 %v4220_v30 }
 0xc96   :  { %4787 = vmatpush3.msra.mxu1 %v5979_v44  ;;  %4788 = vmatprep.mubr.msk.f32.mxu1 %vm5100_vm4, %v5099_v0  ;;  %v3920_v44 = vld [vmem:[%s6237_s16 + $0x18] sm:$0xff]  ;;  %s5054_s16 = scalar_lea.vmem %s4018_s1, 32 }
 0xc97   :  { %4775 = vmatprep.subr.mxu0 %v5099_v0  ;;  %4791 = vmatprep.subr.mxu1 %v5099_v0  ;;  %p5055_p3 = scmp.ne.s32.totalorder %s4018_s1, %s5054_s16  ;;  %p5060_p5 = scmp.lt.s32.totalorder %s5054_s16, %s5054_s16 }
 0xc98   :  { %4776 = vmatpush3.msra.mxu0 %v4219_v1 }
 0xc99   :  { %4789 = vmatmul.mubr.msk.f32.vlgmr.msra.gmra.mxu1 %vm3191_vm9, %v4223_v2  ;;  %4777 = vmatprep.subr.mxu0 %v5099_v0  ;;  %p5061_p6 = por %p5060_p5, %p5059_p4 }
 0xc9a   :  { %4792 = vmatpush3.msra.mxu1 %v4230_v38  ;;  %4803 = vmatprep.mubr.msk.f32.mxu1 %vm5100_vm4, %v5099_v0 }
 0xc9b   :  { %4793 = vmatprep.subr.mxu1 %v5099_v0  ;;  %4778 = vmatpush3.msra.mxu0 %v4218_v43  ;;  %p5062_p7 = pnand %p5061_p6, %p5055_p3 }
 0xc9c   :  { %4794 = vmatpush3.msra.mxu1 %v4229_v51  ;;  %4779 = vmatprep.subr.mxu0 %v5099_v0 }
 0xc9d   :  { %4795 = vmatprep.subr.mxu1 %v5099_v0  ;;  %4780 = vmatpush3.msra.mxu0 %v4217_v46 }
 0xc9e   :  { %4796 = vmatpush3.msra.mxu1 %v4228_v52  ;;  %4781 = vmatprep.subr.mxu0 %v5099_v0 }
 0xc9f   :  { %4797 = vmatprep.subr.mxu1 %v5099_v0  ;;  %4782 = vmatpush3.msra.mxu0 %v4216_v3 }
 0xca0   :  { %4798 = vmatpush3.msra.mxu1 %v4227_v4  ;;  %4806 = vmatprep.subr.mxu0 %v5099_v0 }
 0xca1   :  { %4799 = vmatprep.subr.mxu1 %v5099_v0 }
 0xca2   :  { %4800 = vmatpush3.msra.mxu1 %v4226_v50 }
 0xca3   :  { %4801 = vmatprep.subr.mxu1 %v5099_v0 }
 0xca4   :  { %4802 = vmatpush3.msra.mxu1 %v4225_v5 }
 0xca5   :  { %4839 = vmatprep.subr.mxu1 %v5099_v0 }
 0xd51   :  { %v3422_v36 = vpop.f32.mrf.mxu1  ;;  %v3495_v6 = vpop.f32.mrf.mxu0 }
 0xd52   :  { %v6115_v7 = vadd.f32 %v3495_v6, %v3422_v36 }
 0xd53   :  { %v4750_v8 = vpop.f32.mrf.mxu1  ;;  %v4765_v9 = vpop.f32.mrf.mxu0 }
 0xd55   :  { %v3570_v28 = vpop.f32.mrf.mxu1 }
 0xd56   :  { %4784 = vmatmul.mubr.msk.f32.vlgmr.msra.gmra.mxu0 %vm1774_vm5, %v3570_v28 }
 0xd57   :  { %v4770_v31 = vpop.f32.mrf.mxu1  ;;  %4807 = vmatpush3.msra.mxu0 %v3834_v10  ;;  %4836 = vmatprep.mubr.msk.f32.mxu0 %vm5100_vm4, %v5099_v0 }
 0xd58   :  { %4808 = vmatprep.subr.mxu0 %v5099_v0 }
 0xd59   :  { %v3726_v17 = vpop.f32.mrf.mxu1  ;;  %4809 = vmatpush3.msra.mxu0 %v3833_v12 }
 0xd5a   :  { %4804 = vmatmul.mubr.msk.f32.vlgmr.msra.gmra.mxu1 %vm1774_vm5, %v3726_v17  ;;  %4810 = vmatprep.subr.mxu0 %v5099_v0 }
 0xd5b   :  { %v4790_v19 = vpop.f32.mrf.mxu1  ;;  %4811 = vmatpush3.msra.mxu0 %v3832_v13  ;;  %4855 = vmatprep.mubr.msk.f32.mxu1 %vm5100_vm4, %v5099_v0 }
 0xd5c   :  { %4812 = vmatprep.subr.mxu0 %v5099_v0  ;;  %4840 = vmatpush3.msk.msra.mxu1 %vm221_vm0, %v3924_v29 }
 0xd5d   :  { %4813 = vmatpush3.msra.mxu0 %v3831_v18  ;;  %4841 = vmatprep.subr.mxu1 %v5099_v0 }
 0xd5e   :  { %4814 = vmatprep.subr.mxu0 %v5099_v0  ;;  %4842 = vmatpush3.msra.mxu1 %v3923_v35 }
 0xd5f   :  { %4815 = vmatpush3.msra.mxu0 %v3830_v20  ;;  %4843 = vmatprep.subr.mxu1 %v5099_v0 }
 0xd60   :  { %4816 = vmatprep.subr.mxu0 %v5099_v0  ;;  %4844 = vmatpush3.msra.mxu1 %v3922_v22 }
 0xd61   :  { %4817 = vmatpush3.msra.mxu0 %v3829_v34  ;;  %4845 = vmatprep.subr.mxu1 %v5099_v0 }
 0xd62   :  { %4818 = vmatprep.subr.mxu0 %v5099_v0  ;;  %4846 = vmatpush3.msra.mxu1 %v3921_v41 }
 0xd63   :  { %4819 = vmatpush3.msra.mxu0 %v3828_v21  ;;  %4847 = vmatprep.subr.mxu1 %v5099_v0 }
 0xd64   :  { %4820 = vmatprep.subr.mxu0 %v5099_v0  ;;  %4848 = vmatpush3.msra.mxu1 %v3920_v44 }
 0xd65   :  { %4821 = vmatpush3.msra.mxu0 %v3827_v37  ;;  %4849 = vmatprep.subr.mxu1 %v5099_v0 }
 0xd66   :  { %4822 = vmatprep.subr.mxu0 %v5099_v0  ;;  %4850 = vmatpush3.msra.mxu1 %v3919_v42 }
 0xd67   :  { %4823 = vmatpush3.msra.mxu0 %v3826_v23  ;;  %4851 = vmatprep.subr.mxu1 %v5099_v0 }
 0xd68   :  { %4824 = vmatprep.subr.mxu0 %v5099_v0  ;;  %4852 = vmatpush3.msra.mxu1 %v3918_v57 }
 0xd69   :  { %4825 = vmatpush3.msra.mxu0 %v3825_v15  ;;  %4853 = vmatprep.subr.mxu1 %v5099_v0 }
 0xd6a   :  { %4826 = vmatprep.subr.mxu0 %v5099_v0  ;;  %4854 = vmatpush3.msra.mxu1 %v3917_v58 }
 0xd6b   :  { %4827 = vmatpush3.msra.mxu0 %v3824_v16 }
 0xd6c   :  { %4828 = vmatprep.subr.mxu0 %v5099_v0 }
 0xd6d   :  { %4829 = vmatpush3.msra.mxu0 %v3823_v25 }
 0xd6e   :  { %4830 = vmatprep.subr.mxu0 %v5099_v0 }
 0xd6f   :  { %4831 = vmatpush3.msra.mxu0 %v3822_v11 }
 0xd70   :  { %4832 = vmatprep.subr.mxu0 %v5099_v0 }
 0xd71   :  { %4833 = vmatpush3.msra.mxu0 %v3821_v14 }
 0xd72   :  { %4834 = vmatprep.subr.mxu0 %v5099_v0 }
 0xd73   :  { %4835 = vmatpush3.msra.mxu0 %v3820_v26 }
 0xe16   :  { %v3650_v40 = vpop.f32.mrf.mxu0 }
 0xe17   :  { %v3654_v33 = vadd.f32 %v3650_v40, %v6115_v7 }
 0xe18   :  { %v4785_v47 = vpop.f32.mrf.mxu0 }
 0xe1a   :  { %v3806_v53 = vpop.f32.mrf.mxu1 }
 0xe1b   :  { %v3810_v32 = vadd.f32 %v3806_v53, %v3654_v33 }
 0xe1c   :  { %v4805_v54 = vpop.f32.mrf.mxu1 }
 0xe1d   :  { %v3818_v55 = vadd.f32 %v4232_v39, %v3810_v32 }
 0xe1f   :  { %v3819_v56 = vmax.f32 %v3818_v55, 0.0 }
 0xe21   :  { %4837 = vmatmul.mubr.msk.f32.vlgmr.msra.gmra.mxu0 %vm3842_vm10, %v3819_v56 }
 0xee1   :  { %v3912_v24 = vpop.f32.mrf.mxu0 }
 0xee2   :  { %v3913_v45 = vadd.f32 %v4233_v59, %v3912_v24 }
 0xee3   :  { %v4838_v60 = vpop.f32.mrf.mxu0 }
 0xee4   :  { %v3916_v61 = vmax.f32 %v3913_v45, 0.0 }
 0xee6   :  { %4856 = vmatmul.mubr.msk.f32.vlgmr.msra.gmra.mxu1 %vm3932_vm11, %v3916_v61 }
 0xfa6   :  { %v4005_v62 = vpop.f32.mrf.mxu1 }
 0xfa7   :  { %v4006_v49 = vadd.f32 %v4235_v27, %v4005_v62 }
 0xfa8   :  { %v4857_v48 = vpop.f32.mrf.mxu1 }
 0xfa9   :  { %4010 = vst.msk [vmem:[#allocation17] sm:$0x3] %vm4009_vm12, %v4006_v49 }
 0xfaa   :  { %5065 = shalt.err (!%p5062_p7)
}
 0xfab   :  { %4020 = dma.vmem_to_hbm [thread:$0]  %s4018_s1, 32, %s6239_s18, [#allocation4]  }
 0xfac   :  { %5084 = dma.done.wait [#allocation4], 32  }
 0xfad   :  { %5085 = vsyncadd [#allocation4], 4294967264 }
 0xfae   :  { %4024 = vsyncpa [#allocation3], 1 }
 0xfaf   :  { %4025 = vsyncpa [#allocation6], 1 }
 0xfb0   :  { %4026 = vsyncpa [#allocation9], 1 }
 0xfb1   :  { %4027 = vsyncpa [#allocation12], 1 }
 0xfb2   :  { %4028 = vsyncpa [#allocation15], 1 }
 0xfb3   :  { %4029 = vsyncpa [#allocation4], 1 }

</bundles_post_ra>
